<compile_context>
chip_gen: v7x
topology: tpu7x:2x2x1
jax: 0.10.0
libtpu: 0.0.40
codegen_flags: <defaults>
</compile_context>

<pallas_src>
import functools

import jax
import jax.numpy as jnp
from jax.experimental import pallas as pl
from jax.experimental.pallas import tpu as pltpu


def _round_up(v, m):
    return (v + m - 1) // m * m


def _pad_axis(arr, axis, size):
    pad = size - arr.shape[axis]
    if pad <= 0:
        return arr
    widths = [(0, 0)] * arr.ndim
    widths[axis] = (0, pad)
    return jnp.pad(arr, widths)


# --------------------------- pass 1: Wh = x @ W --------------------------------------
def _proj_kernel(x_ref, w_ref, wh_ref, acc_ref):
    k = pl.program_id(2)

    @pl.when(k == 0)
    def _():
        acc_ref[...] = jnp.zeros_like(acc_ref)

    acc_ref[...] += jnp.dot(x_ref[0], w_ref[...],
                            preferred_element_type=jnp.float32)

    @pl.when(k == pl.num_programs(2) - 1)
    def _():
        wh_ref[0] = acc_ref[...].astype(wh_ref.dtype)


# ----------------- pass 2: masked attention + aggregation + ELU ----------------------
def _attn_kernel(whq_ref, whk_ref, mask_ref, wh2_ref, a1_ref, o_ref, *, alpha):
    whq = whq_ref[0]                                     # (TQ, Fp)  bf16 row tile
    whk = whk_ref[0]                                     # (Np, Fp)  bf16 keys (resident)

    # Row-side attention term on the VPU/XLU instead of a 1-lane-wide MXU matvec.
    wh1 = jnp.sum(whq.astype(jnp.float32) * a1_ref[...],
                  axis=-1, keepdims=True)                # (TQ, 1)

    # e_ij = leakyrelu(wh1_i + wh2_j); wh2 arrives precomputed, lane-dense (1, Np),
    # so no (N,1)->(1,N) transpose is needed.
    e = wh1 + wh2_ref[0]                                 # (TQ, Np)
    e = jnp.where(e > 0.0, e, alpha * e)                 # LeakyReLU (alpha: static float)

    # Adjacency mask (int8 stream) + numerically stable softmax, all in f32 on the VPU.
    adj_mask = mask_ref[0].astype(jnp.float32) > 0.0
    e = jnp.where(adj_mask, e, -9.0e15)
    e = e - jnp.max(e, axis=-1, keepdims=True)
    p = jnp.exp(e)
    # Normalization folded into the (TQ, Fp) epilogue as a per-row scale instead of
    # dividing the whole (TQ, Np) tile.
    inv_l = 1.0 / jnp.sum(p, axis=-1, keepdims=True)     # (TQ, 1)

    hp = jnp.dot(p.astype(jnp.bfloat16), whk,
                 preferred_element_type=jnp.float32)     # (TQ, Fp) f32
    hp = hp * inv_l

    # Outer F.elu from GAT.forward (concat=False => no inner ELU).  exp argument is
    # clamped so the unselected branch never produces inf.
    o_ref[0] = jnp.where(hp > 0.0, hp, jnp.exp(jnp.minimum(hp, 0.0)) - 1.0)


def gat_forward(x, adj, W, a, *, alpha=0.2, row_tile=128):
    """Pallas forward pass of GAT (single GraphAttentionLayer, concat=False, outer ELU)."""
    B, N, f_in = x.shape
    f_out = W.shape[1]
    assert a.shape == (2 * f_out, 1)

    # TODO(synk): dropout on the input and on the attention weights is omitted
    # (eval-mode / inference semantics: identity).

    fp = _round_up(f_out, 128)              # lane-dense Wh / output feature axis
    np_ = _round_up(N, row_tile)            # row-tiled node axis
    if f_in <= 1024:
        kp, tk = f_in, f_in                 # single K step (block == full dim)
    else:
        tk = 512                            # K-tiled projection for huge in_features
        kp = _round_up(f_in, tk)

    # Layout plumbing (plain XLA): zero-pad, bf16 MXU inputs, int8 adjacency mask.
    x_p = _pad_axis(_pad_axis(x, 2, kp), 1, np_).astype(jnp.bfloat16)
    w_p = _pad_axis(_pad_axis(W, 0, kp), 1, fp).astype(jnp.bfloat16)
    a1 = _pad_axis(a[:f_out, 0], 0, fp).astype(jnp.float32).reshape(1, fp)
    a2 = _pad_axis(a[f_out:, 0], 0, fp).astype(jnp.float32)
    mask = _pad_axis(_pad_axis(adj > 0, 1, np_), 2, np_).astype(jnp.int8)

    tm = tq = row_tile

    # ---- pass 1: Wh = x @ W (bf16 MXU, f32 accumulator scratch) ---------------------
    wh = pl.pallas_call(
        _proj_kernel,
        out_shape=jax.ShapeDtypeStruct((B, np_, fp), jnp.bfloat16),
        grid_spec=pltpu.PrefetchScalarGridSpec(
            num_scalar_prefetch=0,
            grid=(B, np_ // tm, kp // tk),
            in_specs=[
                pl.BlockSpec((1, tm, tk), lambda b, i, k: (b, i, k)),
                pl.BlockSpec((tk, fp), lambda b, i, k: (k, 0)),
            ],
            out_specs=pl.BlockSpec((1, tm, fp), lambda b, i, k: (b, i, 0)),
            scratch_shapes=[pltpu.VMEM((tm, fp), jnp.float32)],
        ),
        compiler_params=pltpu.CompilerParams(
            dimension_semantics=("parallel", "parallel", "arbitrary"),
            vmem_limit_bytes=32 * 1024 * 1024),
    )(x_p, w_p)

    # Key-side attention term wh2_j = a2 . Wh_j — tiny [B, Np], fed lane-dense (1, Np).
    wh2 = jnp.einsum("bnf,f->bn", wh.astype(jnp.float32), a2).reshape(B, 1, np_)

    # ---- pass 2: row-tiled masked softmax attention + aggregation + ELU -------------
    out = pl.pallas_call(
        functools.partial(_attn_kernel, alpha=float(alpha)),
        out_shape=jax.ShapeDtypeStruct((B, np_, fp), jnp.float32),
        grid_spec=pltpu.PrefetchScalarGridSpec(
            num_scalar_prefetch=0,
            grid=(B, np_ // tq),
            in_specs=[
                pl.BlockSpec((1, tq, fp), lambda b, q: (b, q, 0)),   # Wh row tile
                pl.BlockSpec((1, np_, fp), lambda b, q: (b, 0, 0)),  # Wh keys (per-batch resident)
                pl.BlockSpec((1, tq, np_), lambda b, q: (b, q, 0)),  # int8 adjacency mask
                pl.BlockSpec((1, 1, np_), lambda b, q: (b, 0, 0)),   # wh2 key term (resident)
                pl.BlockSpec((1, fp), lambda b, q: (0, 0)),          # a1 row
            ],
            out_specs=pl.BlockSpec((1, tq, fp), lambda b, q: (b, q, 0)),
        ),
        compiler_params=pltpu.CompilerParams(
            dimension_semantics=("parallel", "parallel"),
            vmem_limit_bytes=32 * 1024 * 1024),
    )(wh, wh, mask, wh2, a1)

    return out[:, :N, :f_out]


def _xavier_uniform(key, shape, gain):
    fan_in, fan_out = shape[0], shape[1]
    bound = gain * (6.0 / (fan_in + fan_out)) ** 0.5
    return jax.random.uniform(key, shape, jnp.float32, minval=-bound, maxval=bound)


def _reference(x, adj, W, a, alpha=0.2):
    """Pure-JAX reference mirroring the kernel's precision policy (bf16 matmul inputs)."""
    f_out = W.shape[1]
    wh = jnp.einsum("bnf,fo->bno", x.astype(jnp.bfloat16), W.astype(jnp.bfloat16),
                    preferred_element_type=jnp.float32).astype(jnp.bfloat16)
    whf = wh.astype(jnp.float32)
    wh1 = jnp.einsum("bno,o->bn", whf, a[:f_out, 0])
    wh2 = jnp.einsum("bno,o->bn", whf, a[f_out:, 0])
    e = wh1[:, :, None] + wh2[:, None, :]
    e = jnp.where(e > 0, e, alpha * e)
    att = jnp.where(adj > 0, e, -9.0e15)
    att = att - jnp.max(att, axis=-1, keepdims=True)
    p = jnp.exp(att)
    l = jnp.sum(p, axis=-1, keepdims=True)
    hp = jnp.einsum("bnm,bmo->bno",
                    p.astype(jnp.bfloat16).astype(jnp.float32), whf) / l
    return jnp.where(hp > 0, hp, jnp.expm1(hp))


if __name__ == "__main__":
    # Small synthetic shapes (the original module hardcodes 12544 features; the
    # K-tiled projection + row-tiled attention generalize to that size).
    B, N, F = 2, 256, 32
    alpha = 0.2

    key = jax.random.PRNGKey(0)
    kx, kadj, kw, ka = jax.random.split(key, 4)

    x = jax.random.normal(kx, (B, N, F), jnp.float32)
    adj = (jax.random.uniform(kadj, (B, N, N)) > 0.7).astype(jnp.float32)
    adj = jnp.maximum(adj, jnp.eye(N, dtype=jnp.float32)[None])   # self-loops

    W = _xavier_uniform(kw, (F, F), gain=1.414)   # in_features == out_features
    a = _xavier_uniform(ka, (2 * F, 1), gain=1.414)

    fwd = jax.jit(lambda x_, adj_, W_, a_: gat_forward(x_, adj_, W_, a_, alpha=alpha))
    out = jax.block_until_ready(fwd(x, adj, W, a))

    ref = _reference(x, adj, W, a, alpha)
    assert out.shape == (B, N, F)
    max_err = float(jnp.max(jnp.abs(out - ref)))
    # bf16 MXU inputs => compare against a precision-matched reference with bf16-level tolerance.
    assert jnp.allclose(out, ref, atol=2e-2, rtol=2e-2), f"max abs err {max_err}"
    print("KERNEL_OK")
</pallas_src>

<mosaic_0001>
module attributes {stable_mosaic.version = 11 : i64} {
  func.func @_proj_kernel(%arg0: i32, %arg1: i32, %arg2: i32, %arg3: memref<1x128x32xbf16, #tpu.memory_space<vmem>>, %arg4: memref<32x128xbf16, #tpu.memory_space<vmem>>, %arg5: memref<1x128x128xbf16, #tpu.memory_space<vmem>>, %arg6: memref<128x128xf32, #tpu.memory_space<vmem>>) attributes {dimension_semantics = [#tpu.dimension_semantics<parallel>, #tpu.dimension_semantics<parallel>, #tpu.dimension_semantics<arbitrary>], iteration_bounds = array<i64: 2, 2, 1>, scalar_prefetch = 0 : i64, scratch_operands = 1 : i64, tpu.core_type = #tpu.core_type<tc>, window_params = [{transform_indices = @transform_0, window_bounds = array<i64: 1, 128, 32>}, {transform_indices = @transform_1, window_bounds = array<i64: 32, 128>}, {transform_indices = @transform_2, window_bounds = array<i64: 1, 128, 128>}]} {
    %c0_i32 = arith.constant 0 : i32
    %0 = arith.cmpi eq, %arg2, %c0_i32 : i32
    %1 = arith.extui %0 : i1 to i32
    %c0_i32_0 = arith.constant 0 : i32
    %2 = arith.cmpi ne, %1, %c0_i32_0 : i32
    scf.if %2 {
      %cst_11 = arith.constant 0.000000e+00 : f32
      %13 = vector.broadcast %cst_11 : f32 to vector<128x128xf32>
      %c0_12 = arith.constant 0 : index
      %c0_13 = arith.constant 0 : index
      %14 = vector.load %arg6[%c0_12, %c0_13] : memref<128x128xf32, #tpu.memory_space<vmem>>, vector<128x128xf32>
      tpu.vector_store %arg6[%c0_12, %c0_13], %13 {strides = array<i32>} : memref<128x128xf32, #tpu.memory_space<vmem>>, vector<128x128xf32>,
    } else {
    }
    %c0 = arith.constant 0 : index
    %c0_1 = arith.constant 0 : index
    %3 = vector.load %arg6[%c0, %c0_1] : memref<128x128xf32, #tpu.memory_space<vmem>>, vector<128x128xf32>
    %c0_2 = arith.constant 0 : index
    %c0_3 = arith.constant 0 : index
    %c0_4 = arith.constant 0 : index
    %4 = vector.load %arg3[%c0_2, %c0_3, %c0_4] : memref<1x128x32xbf16, #tpu.memory_space<vmem>>, vector<1x128x32xbf16>
    %5 = vector.shape_cast %4 : vector<1x128x32xbf16> to vector<128x32xbf16>
    %c0_5 = arith.constant 0 : index
    %c0_6 = arith.constant 0 : index
    %6 = vector.load %arg4[%c0_5, %c0_6] : memref<32x128xbf16, #tpu.memory_space<vmem>>, vector<32x128xbf16>
    %cst = arith.constant dense<0.000000e+00> : vector<128x128xf32>
    %7 = tpu.matmul %5, %6, %cst {dimension_numbers = #tpu.dot_dimension_numbers<[1], [0], [0], [1], [0, 0, 1, 1], [], []>} : vector<128x32xbf16>, vector<32x128xbf16>, vector<128x128xf32> -> vector<128x128xf32>
    %8 = arith.addf %3, %7 : vector<128x128xf32>
    %c0_7 = arith.constant 0 : index
    %c0_8 = arith.constant 0 : index
    %9 = vector.load %arg6[%c0_7, %c0_8] : memref<128x128xf32, #tpu.memory_space<vmem>>, vector<128x128xf32>
    tpu.vector_store %arg6[%c0_7, %c0_8], %8 {strides = array<i32>} : memref<128x128xf32, #tpu.memory_space<vmem>>, vector<128x128xf32>,
    %c0_i32_9 = arith.constant 0 : i32
    %10 = arith.cmpi eq, %arg2, %c0_i32_9 : i32
    %11 = arith.extui %10 : i1 to i32
    %c0_i32_10 = arith.constant 0 : i32
    %12 = arith.cmpi ne, %11, %c0_i32_10 : i32
    scf.if %12 {
      %c0_11 = arith.constant 0 : index
      %c0_12 = arith.constant 0 : index
      %13 = vector.load %arg6[%c0_11, %c0_12] : memref<128x128xf32, #tpu.memory_space<vmem>>, vector<128x128xf32>
      %14 = arith.truncf %13 : vector<128x128xf32> to vector<128x128xbf16>
      %c0_13 = arith.constant 0 : index
      %c0_14 = arith.constant 0 : index
      %c0_15 = arith.constant 0 : index
      %15 = vector.load %arg5[%c0_13, %c0_14, %c0_15] : memref<1x128x128xbf16, #tpu.memory_space<vmem>>, vector<1x128x128xbf16>
      %16 = vector.shape_cast %15 : vector<1x128x128xbf16> to vector<128x128xbf16>
      %17 = vector.shape_cast %14 : vector<128x128xbf16> to vector<1x128x128xbf16>
      tpu.vector_store %arg5[%c0_13, %c0_14, %c0_15], %17 {strides = array<i32>} : memref<1x128x128xbf16, #tpu.memory_space<vmem>>, vector<1x128x128xbf16>,
    } else {
    }
    return
  }
  func.func @transform_0(%arg0: i32, %arg1: i32, %arg2: i32) -> (i32, i32, i32) {
    %c0_i32 = arith.constant 0 : i32
    return %arg0, %arg1, %arg2 : i32, i32, i32
  }
  func.func @transform_1(%arg0: i32, %arg1: i32, %arg2: i32) -> (i32, i32) {
    %c0_i32 = arith.constant 0 : i32
    %c0_i32_0 = arith.constant 0 : i32
    return %arg2, %c0_i32 : i32, i32
  }
  func.func @transform_2(%arg0: i32, %arg1: i32, %arg2: i32) -> (i32, i32, i32) {
    %c0_i32 = arith.constant 0 : i32
    %c0_i32_0 = arith.constant 0 : i32
    return %arg0, %arg1, %c0_i32 : i32, i32, i32
  }
}

module attributes {stable_mosaic.version = 11 : i64} {
  func.func @_attn_kernel(%arg0: i32, %arg1: i32, %arg2: memref<1x128x128xbf16, #tpu.memory_space<vmem>>, %arg3: memref<1x256x128xbf16, #tpu.memory_space<vmem>>, %arg4: memref<1x128x256xi8, #tpu.memory_space<vmem>>, %arg5: memref<1x1x256xf32, #tpu.memory_space<vmem>>, %arg6: memref<1x128xf32, #tpu.memory_space<vmem>>, %arg7: memref<1x128x128xf32, #tpu.memory_space<vmem>>) attributes {dimension_semantics = [#tpu.dimension_semantics<parallel>, #tpu.dimension_semantics<parallel>], iteration_bounds = array<i64: 2, 2>, scalar_prefetch = 0 : i64, scratch_operands = 0 : i64, tpu.core_type = #tpu.core_type<tc>, window_params = [{transform_indices = @transform_0, window_bounds = array<i64: 1, 128, 128>}, {transform_indices = @transform_1, window_bounds = array<i64: 1, 256, 128>}, {transform_indices = @transform_2, window_bounds = array<i64: 1, 128, 256>}, {transform_indices = @transform_3, window_bounds = array<i64: 1, 1, 256>}, {pipeline_mode = #tpu.pipeline_mode<synchronous>, transform_indices = @transform_4, window_bounds = array<i64: 1, 128>}, {transform_indices = @transform_5, window_bounds = array<i64: 1, 128, 128>}]} {
    %c0 = arith.constant 0 : index
    %c0_0 = arith.constant 0 : index
    %c0_1 = arith.constant 0 : index
    %0 = vector.load %arg2[%c0, %c0_0, %c0_1] : memref<1x128x128xbf16, #tpu.memory_space<vmem>>, vector<1x128x128xbf16>
    %1 = vector.shape_cast %0 : vector<1x128x128xbf16> to vector<128x128xbf16>
    %c0_2 = arith.constant 0 : index
    %c0_3 = arith.constant 0 : index
    %c0_4 = arith.constant 0 : index
    %2 = vector.load %arg3[%c0_2, %c0_3, %c0_4] : memref<1x256x128xbf16, #tpu.memory_space<vmem>>, vector<1x256x128xbf16>
    %3 = vector.shape_cast %2 : vector<1x256x128xbf16> to vector<256x128xbf16>
    %4 = arith.extf %1 : vector<128x128xbf16> to vector<128x128xf32>
    %c0_5 = arith.constant 0 : index
    %c0_6 = arith.constant 0 : index
    %5 = vector.load %arg6[%c0_5, %c0_6] : memref<1x128xf32, #tpu.memory_space<vmem>>, vector<1x128xf32>
    %6 = vector.broadcast %5 : vector<1x128xf32> to vector<128x128xf32>
    %7 = arith.mulf %4, %6 : vector<128x128xf32>
    %cst = arith.constant dense<0.000000e+00> : vector<128xf32>
    %8 = vector.multi_reduction <add>, %7, %cst [1] : vector<128x128xf32> to vector<128xf32>
    %9 = vector.shape_cast %8 : vector<128xf32> to vector<128x1xf32>
    %c0_7 = arith.constant 0 : index
    %c0_8 = arith.constant 0 : index
    %c0_9 = arith.constant 0 : index
    %10 = vector.load %arg5[%c0_7, %c0_8, %c0_9] : memref<1x1x256xf32, #tpu.memory_space<vmem>>, vector<1x1x256xf32>
    %11 = vector.shape_cast %10 : vector<1x1x256xf32> to vector<1x256xf32>
    %12 = vector.broadcast %9 : vector<128x1xf32> to vector<128x256xf32>
    %13 = vector.broadcast %11 : vector<1x256xf32> to vector<128x256xf32>
    %14 = arith.addf %12, %13 : vector<128x256xf32>
    %cst_10 = arith.constant 0.000000e+00 : f32
    %15 = vector.broadcast %cst_10 : f32 to vector<128x256xf32>
    %16 = arith.cmpf ogt, %14, %15 : vector<128x256xf32>
    %cst_11 = arith.constant 2.000000e-01 : f32
    %17 = vector.broadcast %cst_11 : f32 to vector<128x256xf32>
    %18 = arith.mulf %17, %14 : vector<128x256xf32>
    %19 = arith.select %16, %14, %18 : vector<128x256xi1>, vector<128x256xf32>
    %c0_12 = arith.constant 0 : index
    %c0_13 = arith.constant 0 : index
    %c0_14 = arith.constant 0 : index
    %20 = vector.load %arg4[%c0_12, %c0_13, %c0_14] : memref<1x128x256xi8, #tpu.memory_space<vmem>>, vector<1x128x256xi8>
    %21 = vector.shape_cast %20 : vector<1x128x256xi8> to vector<128x256xi8>
    %22 = arith.sitofp %21 : vector<128x256xi8> to vector<128x256xf32>
    %cst_15 = arith.constant 0.000000e+00 : f32
    %23 = vector.broadcast %cst_15 : f32 to vector<128x256xf32>
    %24 = arith.cmpf ogt, %22, %23 : vector<128x256xf32>
    %cst_16 = arith.constant -9.000000e+15 : f32
    %25 = vector.broadcast %cst_16 : f32 to vector<128x256xf32>
    %26 = arith.select %24, %19, %25 : vector<128x256xi1>, vector<128x256xf32>
    %cst_17 = arith.constant dense<0xFF800000> : vector<128xf32>
    %27 = vector.multi_reduction <maximumf>, %26, %cst_17 [1] : vector<128x256xf32> to vector<128xf32>
    %28 = vector.shape_cast %27 : vector<128xf32> to vector<128x1xf32>
    %29 = vector.broadcast %28 : vector<128x1xf32> to vector<128x256xf32>
    %30 = arith.subf %26, %29 : vector<128x256xf32>
    %31 = math.exp %30 : vector<128x256xf32>
    %cst_18 = arith.constant dense<0.000000e+00> : vector<128xf32>
    %32 = vector.multi_reduction <add>, %31, %cst_18 [1] : vector<128x256xf32> to vector<128xf32>
    %33 = vector.shape_cast %32 : vector<128xf32> to vector<128x1xf32>
    %cst_19 = arith.constant 1.000000e+00 : f32
    %34 = vector.broadcast %cst_19 : f32 to vector<128x1xf32>
    %35 = arith.divf %34, %33 : vector<128x1xf32>
    %36 = arith.truncf %31 : vector<128x256xf32> to vector<128x256xbf16>
    %cst_20 = arith.constant dense<0.000000e+00> : vector<128x128xf32>
    %37 = tpu.matmul %36, %3, %cst_20 {dimension_numbers = #tpu.dot_dimension_numbers<[1], [0], [0], [1], [0, 0, 1, 1], [], []>} : vector<128x256xbf16>, vector<256x128xbf16>, vector<128x128xf32> -> vector<128x128xf32>
    %38 = vector.broadcast %35 : vector<128x1xf32> to vector<128x128xf32>
    %39 = arith.mulf %37, %38 : vector<128x128xf32>
    %cst_21 = arith.constant 0.000000e+00 : f32
    %40 = vector.broadcast %cst_21 : f32 to vector<128x128xf32>
    %41 = arith.cmpf ogt, %39, %40 : vector<128x128xf32>
    %cst_22 = arith.constant 0.000000e+00 : f32
    %42 = vector.broadcast %cst_22 : f32 to vector<128x128xf32>
    %43 = arith.minimumf %39, %42 : vector<128x128xf32>
    %44 = math.exp %43 : vector<128x128xf32>
    %cst_23 = arith.constant 1.000000e+00 : f32
    %45 = vector.broadcast %cst_23 : f32 to vector<128x128xf32>
    %46 = arith.subf %44, %45 : vector<128x128xf32>
    %47 = arith.select %41, %39, %46 : vector<128x128xi1>, vector<128x128xf32>
    %c0_24 = arith.constant 0 : index
    %c0_25 = arith.constant 0 : index
    %c0_26 = arith.constant 0 : index
    %48 = vector.load %arg7[%c0_24, %c0_25, %c0_26] : memref<1x128x128xf32, #tpu.memory_space<vmem>>, vector<1x128x128xf32>
    %49 = vector.shape_cast %48 : vector<1x128x128xf32> to vector<128x128xf32>
    %50 = vector.shape_cast %47 : vector<128x128xf32> to vector<1x128x128xf32>
    tpu.vector_store %arg7[%c0_24, %c0_25, %c0_26], %50 {strides = array<i32>} : memref<1x128x128xf32, #tpu.memory_space<vmem>>, vector<1x128x128xf32>,
    return
  }
  func.func @transform_0(%arg0: i32, %arg1: i32) -> (i32, i32, i32) {
    %c0_i32 = arith.constant 0 : i32
    %c0_i32_0 = arith.constant 0 : i32
    return %arg0, %arg1, %c0_i32 : i32, i32, i32
  }
  func.func @transform_1(%arg0: i32, %arg1: i32) -> (i32, i32, i32) {
    %c0_i32 = arith.constant 0 : i32
    %c0_i32_0 = arith.constant 0 : i32
    %c0_i32_1 = arith.constant 0 : i32
    return %arg0, %c0_i32, %c0_i32_0 : i32, i32, i32
  }
  func.func @transform_2(%arg0: i32, %arg1: i32) -> (i32, i32, i32) {
    %c0_i32 = arith.constant 0 : i32
    %c0_i32_0 = arith.constant 0 : i32
    return %arg0, %arg1, %c0_i32 : i32, i32, i32
  }
  func.func @transform_3(%arg0: i32, %arg1: i32) -> (i32, i32, i32) {
    %c0_i32 = arith.constant 0 : i32
    %c0_i32_0 = arith.constant 0 : i32
    %c0_i32_1 = arith.constant 0 : i32
    return %arg0, %c0_i32, %c0_i32_0 : i32, i32, i32
  }
  func.func @transform_4(%arg0: i32, %arg1: i32) -> (i32, i32) {
    %c0_i32 = arith.constant 0 : i32
    %c0_i32_0 = arith.constant 0 : i32
    %c0_i32_1 = arith.constant 0 : i32
    return %c0_i32, %c0_i32_0 : i32, i32
  }
  func.func @transform_5(%arg0: i32, %arg1: i32) -> (i32, i32, i32) {
    %c0_i32 = arith.constant 0 : i32
    %c0_i32_0 = arith.constant 0 : i32
    return %arg0, %arg1, %c0_i32 : i32, i32, i32
  }
}

</mosaic_0001>

<bundles_post_ra>
// kernel: _lambda_.2
= control target key start
LH: loop header
LB: loop body
LE: loop exit
PB: predicated region body
PF: predicated region fallthrough
CT: control target
= control target key end

     0   :  { %s946_s9 = smov 0   ;;  %s948_s10 = smov 0   ;;  %s1011_s0 = inlined_call_operand.vmem [shape: bf16[2,256,32], index: 0, kind: input, shape index: {}]   ;;  %s1012_s1 = inlined_call_operand.vmem [shape: bf16[32,128], index: 1, kind: input, shape index: {}]   ;;  %s1013_s2 = inlined_call_operand.vmem [shape: bf16[2,256,128], index: 2, kind: output, shape index: {}]  }
   0x1   :  { %s950_s11 = smov 0   ;;  %s952_s12 = smov 0  }
   0x2   :  { %s954_s13 = smov 0  }
   0x3 LB: > { %s27_s14 = sadd.s32 1, %s921_s11  ;;  %s31_s15 = sadd.s32 1, %s925_s12  ;;  %s929_s13 = sphi %s954_s13, %s12_s13   ;;  %s925_s12 = sphi %s952_s12, %s1017_s12   ;;  %s921_s11 = sphi %s950_s11, %s1016_s11   ;;  %s917_s10 = sphi %s948_s10, %s1015_s10   ;;  %s913_s9 = sphi %s946_s9, %s1014_s9  }
   0x4   : > { %p29_p0 = scmp.ge.s32.totalorder %s27_s14, 2  ;;  %p701_p1 = scmp.ge.s32.totalorder %s929_s13, 1 }
   0x5   : > { %p156_p2 = scmp.lt.s32.totalorder %s929_s13, 5 }
   0x6   : > { %s1019_s14 = smov (%p29_p0, %s27_s14), 0  ;;  %s1021_s15 = smov (!%p29_p0, %s31_s15), %s925_s12 }
   0x7   : > { %p157_p3 = pnand %p701_p1, %p156_p2  ;;  %p33_p4 = scmp.ge.s32.totalorder %s1021_s15, 2 }
   0x8   : > { %v881_v0 = vld [vmem:[%s1012_s1] sm:$0xff] (!%p157_p3)   ;;  %s702_s18 = sshll.u32 (!%p157_p3), %s913_s9, 4  ;;  %v882_v1 = vld [vmem:[%s1012_s1 + $0x8] sm:$0xff] (!%p157_p3)   ;;  %p195_p5 = scmp.lt.s32.totalorder (!%p157_p3), %s917_s10, 1  ;;  %vm332_vm0 = vcmask (!%p157_p3), 261120  }
   0x9   : > { %s1023_s15 = smov (%p33_p4, %s1021_s15), 0  ;;  %160 = sbr.rel (%p157_p3) target bundleno = 250 (0xfa), region = 28 }
   0xa   : > { %817 = vmatprep.subr.bf16.mxu0 (!%p157_p3), %v881_v0  ;;  %837 = vmatprep.subr.bf16.mxu1 (!%p157_p3), %v881_v0  ;;  %p197_p6 = scmp.lt.s32.totalorder (!%p157_p3), %s702_s18, 31 }
   0xb   : > { %818 = vmatpush3.bf16.msra.mxu0 (!%p157_p3), %v881_v0  ;;  %839 = vmatpush3.bf16.msra.mxu1 (!%p157_p3), %v881_v0 }
   0xc   : > { %819 = vmatprep.subr.bf16.mxu0 (!%p157_p3), %v882_v1  ;;  %838 = vmatprep.subr.bf16.mxu1 (!%p157_p3), %v882_v1 }
   0xf   : > { %820 = vmatpush3.bf16.msra.mxu0 (!%p157_p3), %v882_v1  ;;  %840 = vmatpush3.bf16.msra.mxu1 (!%p157_p3), %v882_v1 }
  0x10   : > { %s1025_s10 = smov (!%p195_p5, %s917_s10), 1  ;;  %s1027_s18 = smov (!%p197_p6, %s702_s18), 31 }
  0x11   : > { %s703_s21 = sshll.u32 %s1025_s10, 5 }
  0x12   : > { %s203_s22 = sadd.s32 %s703_s21, %s1027_s18 }
  0x13   : > { %s704_s23 = sshll.u32 %s203_s22, 2 }
  0x14   : > { %s205_s26 = scalar_lea.vmem %s1011_s0, %s704_s23  ;;  %s221_s29 = scalar_lea.vmem %s1013_s2, %s704_s23 }
  0x15   : > { %v883_v2 = vld [vmem:[%s205_s26] sm:$0xff]   ;;  %v885_v4 = vld [vmem:[%s205_s26 + $0x8] sm:$0xff]   ;;  %v887_v6 = vld [vmem:[%s205_s26 + $0x10] sm:$0xff]  }
  0x16   : > { %v884_v3 = vld [vmem:[%s205_s26 + $0x20] sm:$0xff]   ;;  %821 = vmatprep.mubr.msk.bf16.mxu0 %vm332_vm0, %v883_v2  ;;  %v886_v5 = vld [vmem:[%s205_s26 + $0x28] sm:$0xff]   ;;  %v888_v7 = vld [vmem:[%s205_s26 + $0x30] sm:$0xff]  }
  0x17   : > { %829 = vmatprep.mubr.msk.bf16.mxu1 %vm332_vm0, %v884_v3  ;;  %822 = vmatmul.mubr.msk.bf16.vlgmr.msra.gmra.mrb[0].mxu0 %vm332_vm0, %v885_v4  ;;  %v889_v8 = vld [vmem:[%s205_s26 + $0x18] sm:$0xff]  }
  0x18   : > { %830 = vmatmul.mubr.msk.bf16.vlgmr.msra.gmra.mrb[0].mxu1 %vm332_vm0, %v886_v5  ;;  %825 = vmatprep.mubr.msk.bf16.mxu0 %vm332_vm0, %v887_v6  ;;  %v890_v9 = vld [vmem:[%s205_s26 + $0x38] sm:$0xff]  }
  0x19   : > { %833 = vmatprep.mubr.msk.bf16.mxu1 %vm332_vm0, %v888_v7 }
  0x1f   : > { %826 = vmatmul.mubr.msk.bf16.gmra.mrb[4].mxu0 %vm332_vm0, %v889_v8 }
  0x20   : > { %834 = vmatmul.mubr.msk.bf16.gmra.mrb[4].mxu1 %vm332_vm0, %v890_v9 }
  0xea   : > { %v823_v10 = vpop.f32.mrb[0].mxu0 }
  0xeb   : > { %v831_v11 = vpop.f32.mrb[0].mxu1  ;;  %v391_v12 = vpop.f32.mrb[1].mxu0 }
  0xec   : > { %v423_v13 = vpop.f32.mrb[1].mxu1  ;;  %v824_v14 = vpop.f32.mrb[2].mxu0 }
  0xed   : > { %v768_v15 = vpack.c.bf16 %v824_v14, %v823_v10  ;;  %v832_v16 = vpop.f32.mrb[2].mxu1  ;;  %v394_v17 = vpop.f32.mrb[3].mxu0 }
  0xee   : > { %v788_v18 = vpack.c.bf16 %v832_v16, %v831_v11  ;;  %v763_v19 = vpack.c.bf16 %v394_v17, %v391_v12  ;;  %v426_v20 = vpop.f32.mrb[3].mxu1 }
  0xef   : > { %800 = vst [vmem:[%s221_s29 + $0x8] sm:$0xff] %v768_v15   ;;  %v783_v21 = vpack.c.bf16 %v426_v20, %v423_v13 }
  0xf0   : > { %804 = vst [vmem:[%s221_s29 + $0x28] sm:$0xff] %v788_v18   ;;  %764 = vst [vmem:[%s221_s29] sm:$0xff] %v763_v19  }
  0xf1   : > { %803 = vst [vmem:[%s221_s29 + $0x20] sm:$0xff] %v783_v21  }
  0xf2   : > { %v827_v22 = vpop.f32.mrb[4].mxu0 }
  0xf3   : > { %v835_v23 = vpop.f32.mrb[4].mxu1  ;;  %v407_v24 = vpop.f32.mrb[5].mxu0 }
  0xf4   : > { %v439_v25 = vpop.f32.mrb[5].mxu1  ;;  %v828_v26 = vpop.f32.mrb[6].mxu0 }
  0xf5   : > { %v778_v27 = vpack.c.bf16 %v828_v26, %v827_v22  ;;  %v836_v28 = vpop.f32.mrb[6].mxu1  ;;  %v410_v29 = vpop.f32.mrb[7].mxu0 }
  0xf6   : > { %v798_v30 = vpack.c.bf16 %v836_v28, %v835_v23  ;;  %v773_v31 = vpack.c.bf16 %v410_v29, %v407_v24  ;;  %v442_v32 = vpop.f32.mrb[7].mxu1 }
  0xf7   : > { %802 = vst [vmem:[%s221_s29 + $0x18] sm:$0xff] %v778_v27   ;;  %v793_v33 = vpack.c.bf16 %v442_v32, %v439_v25 }
  0xf8   : > { %806 = vst [vmem:[%s221_s29 + $0x38] sm:$0xff] %v798_v30   ;;  %801 = vst [vmem:[%s221_s29 + $0x10] sm:$0xff] %v773_v31  }
  0xf9   : > { %805 = vst [vmem:[%s221_s29 + $0x30] sm:$0xff] %v793_v33  }
  0xfa PF: > { %s12_s13 = sadd.s32 1, %s929_s13   ;;  %s1014_s9 = smov %s921_s11 }
  0xfb   : > { %p9_p7 = scmp.ge.s32.totalorder %s12_s13, 6   ;;  %s1015_s10 = smov %s925_s12 }
  0xfc   : > { %s1016_s11 = smov %s1019_s14  ;;  %s1017_s12 = smov %s1023_s15 }
  0xfd   :  { %11 = sbr.rel (!%p9_p7) target bundleno = 3 (0x3), region = 69 }

// kernel: _lambda_.3
= control target key start
LH: loop header
LB: loop body
LE: loop exit
PB: predicated region body
PF: predicated region fallthrough
CT: control target
= control target key end

     0   :  { %s1859_s18 = smov 0   ;;  %s1861_s19 = smov 0   ;;  %s2554_s0 = inlined_call_operand.vmem [shape: bf16[2,256,128], index: 0, kind: input, shape index: {}, may-alias: {0,1}]   ;;  %s2555_s1 = inlined_call_operand.vmem [shape: bf16[2,256,128], index: 1, kind: input, shape index: {}, may-alias: {0,1}]   ;;  %s2556_s2 = inlined_call_operand.vmem [shape: s8[2,256,256], index: 2, kind: input, shape index: {}]   ;;  %s2557_s3 = inlined_call_operand.vmem [shape: f32[2,1,256], index: 3, kind: input, shape index: {}]   ;;  %s2558_s4 = inlined_call_operand.vmem [shape: f32[1,128], index: 4, kind: input, shape index: {}]   ;;  %s2559_s5 = inlined_call_operand.vmem [shape: f32[2,256,128], index: 5, kind: output, shape index: {}]  }
   0x1   :  { %s1863_s20 = smov 0   ;;  %s1865_s21 = smov 0  }
   0x2   :  { %s1867_s22 = smov 0  }
   0x3 LB: > { %s24_s23 = sadd.s32 1, %s1819_s20  ;;  %s27_s24 = sadd.s32 1, %s1823_s21  ;;  %s1827_s22 = sphi %s1867_s22, %s15_s22   ;;  %s1823_s21 = sphi %s1865_s21, %s2566_s21   ;;  %s1819_s20 = sphi %s1863_s20, %s2565_s20   ;;  %s1815_s19 = sphi %s1861_s19, %s2564_s19   ;;  %s1811_s18 = sphi %s1859_s18, %s2563_s18  }
   0x4   : > { %p25_p0 = scmp.ge.s32.totalorder %s24_s23, 2  ;;  %p1436_p1 = scmp.ge.s32.totalorder %s1827_s22, 1 }
   0x5   : > { %p245_p2 = scmp.lt.s32.totalorder %s1827_s22, 5 }
   0x6   : > { %s2568_s23 = smov (%p25_p0, %s24_s23), 0  ;;  %s2570_s24 = smov (!%p25_p0, %s27_s24), %s1823_s21 }
   0x7   : > { %p246_p3 = pnand %p1436_p1, %p245_p2  ;;  %p29_p4 = scmp.ge.s32.totalorder %s2570_s24, 2 }
   0x9   : > { %s2572_s24 = smov (%p29_p4, %s2570_s24), 0  ;;  %249 = sbr.rel (%p246_p3) target bundleno = 624 (0x270), region = 40 }
  0x10   : > { %s1437_s25 = sshll.u32 %s1811_s18, 4  ;;  %p301_p5 = scmp.lt.s32.totalorder %s1815_s19, 1  ;;  %v1450_v1 = vld [vmem:[%s2558_s4] ss:$0 sm:$0xff]  ;;  %v462_v47 = vlaneseq }
  0x11   : > { %p303_p6 = scmp.lt.s32.totalorder %s1437_s25, 31  ;;  %s1442_s13 = sshll.u32 %s1811_s18, 2 }
  0x12   : > { %s2574_s19 = smov (!%p301_p5, %s1815_s19), 1  ;;  %p318_p7 = scmp.lt.s32.totalorder %s1442_s13, 7  ;;  %v463_v48 = vshrl.u32 %v462_v47, 7 }
  0x13   : > { %s2576_s25 = smov (!%p303_p6, %s1437_s25), 31  ;;  %s1438_s26 = sshll.u32 %s2574_s19, 5 }
  0x14   : > { %s1485_s27 = sshll.u32 %s2574_s19, 7  ;;  %s1896_s28 = sadd.s32 %s1438_s26, %s2576_s25  ;;  %v464_v52 = vsub.s32 0, %v463_v48  ;;  %v468_v55 = vsub.s32 1, %v463_v48 }
  0x15   : > { %s1901_s6 = scalar_lea.vmem %s2555_s1, %s1485_s27  ;;  %s1439_s7 = sshll.u32 %s1896_s28, 2 }
  0x16   : > { %s1907_s10 = scalar_lea.vmem %s2554_s0, %s1439_s7  ;;  %v1645_v41 = vld [vmem:[%s1901_s6 + $0x40] sm:$0xff]   ;;  %v1647_v43 = vld [vmem:[%s1901_s6 + $0x48] sm:$0xff]   ;;  %v1649_v45 = vld [vmem:[%s1901_s6 + $0x50] sm:$0xff]   ;;  %s2578_s13 = smov (!%p318_p7, %s1442_s13), 7 }
  0x17   : > { %v1487_v0 = vld [vmem:[%s1907_s10] sm:$0xff]   ;;  %v1518_v7 = vld [vmem:[%s1907_s10 + $0x8] sm:$0xff]   ;;  %v1519_v19 = vld [vmem:[%s1907_s10 + $0x10] sm:$0xff]   ;;  %1525 = vmatprep.subr.bf16.mxu0 %v1645_v41  ;;  %1589 = vmatprep.subr.bf16.mxu1 %v1645_v41  ;;  %s1443_s14 = sshll.u32 %s2578_s13, 1  ;;  %s1444_s15 = sshll.u32 %s2574_s19, 4 }
  0x18   : > { %v1521_v2 = vld [vmem:[%s1907_s10 + $0x20] sm:$0xff]   ;;  %v1488_v3 = vunpack.c.l.bf16 %v1487_v0  ;;  %v1489_v5 = vunpack.c.h.bf16 %v1487_v0  ;;  %v1522_v10 = vld [vmem:[%s1907_s10 + $0x28] sm:$0xff]   ;;  %v1492_v13 = vunpack.c.l.bf16 %v1518_v7  ;;  %v1493_v14 = vunpack.c.h.bf16 %v1518_v7  ;;  %v1523_v24 = vld [vmem:[%s1907_s10 + $0x30] sm:$0xff]   ;;  %s322_s16 = sadd.s32 %s1444_s15, %s1443_s14  ;;  %s1446_s25 = sshll.u32 %s2574_s19, 1 }
  0x19   : > { %v1504_v4 = vunpack.c.l.bf16 %v1521_v2  ;;  %v1505_v6 = vunpack.c.h.bf16 %v1521_v2  ;;  %v1508_v17 = vunpack.c.l.bf16 %v1522_v10  ;;  %v1509_v18 = vunpack.c.h.bf16 %v1522_v10  ;;  %v1520_v29 = vld [vmem:[%s1907_s10 + $0x18] sm:$0xff]   ;;  %v1646_v42 = vld [vmem:[%s1901_s6] sm:$0xff]   ;;  %v1648_v44 = vld [vmem:[%s1901_s6 + $0x8] sm:$0xff]   ;;  %s1445_s17 = sshll.u32 %s322_s16, 3  ;;  %s329_s18 = scalar_lea.vmem %s2557_s3, %s1446_s25 }
  0x1a   : > { %v412_v8 = vmul.f32 %v1488_v3, %v1450_v1  ;;  %v413_v11 = vmul.f32 %v1489_v5, %v1450_v1  ;;  %v414_v15 = vmul.f32 %v1492_v13, %v1450_v1  ;;  %v415_v16 = vmul.f32 %v1493_v14, %v1450_v1  ;;  %v1524_v34 = vld [vmem:[%s1907_s10 + $0x38] sm:$0xff]   ;;  %1526 = vmatpush3.bf16.msra.mxu0 %v1646_v42  ;;  %v1650_v46 = vld [vmem:[%s1901_s6 + $0x10] sm:$0xff]   ;;  %s1932_s29 = scalar_lea.vmem %s2556_s2, %s1445_s17  ;;  %v460_v54 = vld [vmem:[%s329_s18] sm:$0x3]  ;;  %s1449_s19 = sshll.u32 %s1896_s28, 3 }
  0x1b   : > { %v420_v9 = vmul.f32 %v1504_v4, %v1450_v1  ;;  %v421_v12 = vmul.f32 %v1505_v6, %v1450_v1  ;;  %v422_v20 = vmul.f32 %v1508_v17, %v1450_v1  ;;  %v423_v21 = vmul.f32 %v1509_v18, %v1450_v1  ;;  %1597 = vmatpush3.bf16.msra.mxu1 %v1646_v42  ;;  %v600_v49 = vld [vmem:[%s1932_s29] sm:$0xff]  ;;  %v601_v50 = vld [vmem:[%s1932_s29 + $0x8] sm:$0xff]  ;;  %v603_v13 = vld [vmem:[%s1932_s29 + $0x18] sm:$0xff]  ;;  %s2474_s28 = scalar_lea.vmem %s2559_s5, %s1449_s19 }
  0x1c   : > { %428 = vadd.xlane.f32.xlu0 %v412_v8  ;;  %v1496_v22 = vunpack.c.l.bf16 %v1519_v19  ;;  %v1497_v23 = vunpack.c.h.bf16 %v1519_v19  ;;  %v1512_v27 = vunpack.c.l.bf16 %v1523_v24  ;;  %v1513_v28 = vunpack.c.h.bf16 %v1523_v24  ;;  %1527 = vmatprep.subr.bf16.mxu0 %v1647_v43  ;;  %v604_v51 = vld [vmem:[%s1932_s29 + $0x20] sm:$0xff]  ;;  %v605_v53 = vld [vmem:[%s1932_s29 + $0x28] sm:$0xff] }
  0x1d   : > { %444 = vadd.xlane.f32.xlu1 %v420_v9  ;;  %v1500_v32 = vunpack.c.l.bf16 %v1520_v29  ;;  %v1501_v33 = vunpack.c.h.bf16 %v1520_v29  ;;  %v1516_v37 = vunpack.c.l.bf16 %v1524_v34  ;;  %v1517_v38 = vunpack.c.h.bf16 %v1524_v34  ;;  %1590 = vmatprep.subr.bf16.mxu1 %v1647_v43 }
  0x1e   : > { %v416_v25 = vmul.f32 %v1496_v22, %v1450_v1  ;;  %v417_v26 = vmul.f32 %v1497_v23, %v1450_v1  ;;  %v424_v30 = vmul.f32 %v1512_v27, %v1450_v1  ;;  %v425_v31 = vmul.f32 %v1513_v28, %v1450_v1  ;;  %1528 = vmatpush3.bf16.msra.mxu0 %v1648_v44  ;;  %v606_v22 = vld [vmem:[%s1932_s29 + $0x30] sm:$0xff]  ;;  %v1971_v23 = vld [vmem:[%s1932_s29 + $0x38] sm:$0xff] }
  0x1f   : > { %v418_v35 = vmul.f32 %v1500_v32, %v1450_v1  ;;  %v419_v36 = vmul.f32 %v1501_v33, %v1450_v1  ;;  %v426_v39 = vmul.f32 %v1516_v37, %v1450_v1  ;;  %v427_v40 = vmul.f32 %v1517_v38, %v1450_v1  ;;  %1598 = vmatpush3.bf16.msra.mxu1 %v1648_v44 }
  0x20   : > { %430 = vadd.xlane.f32.xlu0 %v413_v11  ;;  %1529 = vmatprep.subr.bf16.mxu0 %v1649_v45  ;;  %v608_v56 = vunpack.c.0.s8 %v600_v49  ;;  %v609_v57 = vunpack.c.0.s8 %v601_v50  ;;  %v624_v58 = vunpack.c.0.s8 %v604_v51  ;;  %v625_v59 = vunpack.c.0.s8 %v605_v53 }
  0x21   : > { %446 = vadd.xlane.f32.xlu1 %v421_v12  ;;  %1591 = vmatprep.subr.bf16.mxu1 %v1649_v45  ;;  %v1941_v60 = vrot.slane %v460_v54, %v464_v52  ;;  %v610_v61 = vunpack.c.1.s8 %v600_v49  ;;  %v611_v62 = vunpack.c.1.s8 %v601_v50  ;;  %v626_v63 = vunpack.c.1.s8 %v604_v51  ;;  %v602_v12 = vld [vmem:[%s1932_s29 + $0x10] sm:$0xff] }
  0x22   : > { %1530 = vmatpush3.bf16.msra.mxu0 %v1650_v46  ;;  %v627_v0 = vunpack.c.1.s8 %v605_v53  ;;  %v612_v1 = vunpack.c.2.s8 %v600_v49  ;;  %v613_v2 = vunpack.c.2.s8 %v601_v50  ;;  %v614_v3 = vunpack.c.3.s8 %v600_v49 }
  0x23   : > { %1599 = vmatpush3.bf16.msra.mxu1 %v1650_v46  ;;  %v1943_v4 = vrot.slane %v460_v54, %v468_v55  ;;  %v1945_v5 = vcvt.s32.f32 %v608_v56  ;;  %v1947_v6 = vcvt.s32.f32 %v609_v57  ;;  %v1949_v7 = vcvt.s32.f32 %v624_v58 }
  0x24   : > { %432 = vadd.xlane.f32.xlu0 %v414_v15  ;;  %v1951_v8 = vcvt.s32.f32 %v625_v59  ;;  %v615_v9 = vunpack.c.3.s8 %v601_v50  ;;  %v628_v10 = vunpack.c.2.s8 %v604_v51  ;;  %v629_v11 = vunpack.c.2.s8 %v605_v53 }
  0x25   : > { %434 = vadd.xlane.f32.xlu1 %v415_v16  ;;  %v1955_v14 = vcvt.s32.f32 %v610_v61  ;;  %v1957_v15 = vcvt.s32.f32 %v611_v62  ;;  %v1959_v16 = vcvt.s32.f32 %v626_v63  ;;  %v630_v17 = vunpack.c.3.s8 %v604_v51 }
  0x26   : > { %v1961_v18 = vcvt.s32.f32 %v627_v0  ;;  %v1963_v19 = vcvt.s32.f32 %v612_v1  ;;  %v631_v24 = vunpack.c.3.s8 %v605_v53  ;;  %v618_v27 = vunpack.c.1.s8 %v602_v12 }
  0x27   : > { %v1973_v28 = vcvt.s32.f32 %v615_v9  ;;  %v1975_v29 = vcvt.s32.f32 %v628_v10  ;;  %v1979_v32 = vcvt.s32.f32 %v630_v17  ;;  %v632_v33 = vunpack.c.0.s8 %v606_v22 }
  0x28   : > { %448 = vadd.xlane.f32.xlu0 %v422_v20  ;;  %v1965_v20 = vcvt.s32.f32 %v613_v2  ;;  %v633_v34 = vunpack.c.0.s8 %v1971_v23  ;;  %v620_v37 = vunpack.c.2.s8 %v602_v12  ;;  %v621_v38 = vunpack.c.2.s8 %v603_v13 }
  0x29   : > { %450 = vadd.xlane.f32.xlu1 %v423_v21  ;;  %v1967_v21 = vcvt.s32.f32 %v614_v3  ;;  %vm672_vm0 = vcmp.gt.f32.partialorder %v1945_v5, 0.0  ;;  %vm673_vm1 = vcmp.gt.f32.partialorder %v1947_v6, 0.0  ;;  %v1991_v43 = vcvt.s32.f32 %v618_v27 }
  0x2a   : > { %v623_v45 = vunpack.c.3.s8 %v603_v13  ;;  %v636_v46 = vunpack.c.2.s8 %v606_v22  ;;  %v637_v47 = vunpack.c.2.s8 %v1971_v23  ;;  %vm688_vm2 = vcmp.gt.f32.partialorder %v1949_v7, 0.0 }
  0x2b   : > { %vm689_vm3 = vcmp.gt.f32.partialorder %v1951_v8, 0.0  ;;  %v1998_v48 = vcvt.s32.f32 %v632_v33  ;;  %v2000_v49 = vcvt.s32.f32 %v633_v34  ;;  %v638_v51 = vunpack.c.3.s8 %v606_v22 }
  0x2c   : > { %436 = vadd.xlane.f32.xlu0 %v416_v25  ;;  %v616_v25 = vunpack.c.0.s8 %v602_v12  ;;  %v2006_v55 = vcvt.s32.f32 %v620_v37  ;;  %v2008_v56 = vcvt.s32.f32 %v621_v38  ;;  %vm674_vm4 = vcmp.gt.f32.partialorder %v1955_v14, 0.0 }
  0x2d   : > { %438 = vadd.xlane.f32.xlu1 %v417_v26  ;;  %v617_v26 = vunpack.c.0.s8 %v603_v13  ;;  %v2017_v63 = vcvt.s32.f32 %v623_v45  ;;  %v2019_v0 = vcvt.s32.f32 %v636_v46  ;;  %v2021_v1 = vcvt.s32.f32 %v637_v47 }
  0x2e   : > { %v1987_v41 = vcvt.s32.f32 %v616_v25  ;;  %v639_v2 = vunpack.c.3.s8 %v1971_v23  ;;  %vm675_vm5 = vcmp.gt.f32.partialorder %v1957_v15, 0.0  ;;  %vm690_vm9 = vcmp.gt.f32.partialorder %v1959_v16, 0.0 }
  0x2f   : > { %v1989_v42 = vcvt.s32.f32 %v617_v26  ;;  %vm691_vm11 = vcmp.gt.f32.partialorder %v1961_v18, 0.0  ;;  %vm676_vm12 = vcmp.gt.f32.partialorder %v1963_v19, 0.0  ;;  %vm677_vm13 = vcmp.gt.f32.partialorder %v1965_v20, 0.0 }
  0x30   : > { %452 = vadd.xlane.f32.xlu0 %v424_v30  ;;  %v1977_v30 = vcvt.s32.f32 %v629_v11  ;;  %v2025_v11 = vcvt.s32.f32 %v638_v51  ;;  %v2042_v47 = vcvt.s32.f32 %v639_v2 }
  0x31   : > { %454 = vadd.xlane.f32.xlu1 %v425_v31  ;;  %v619_v31 = vunpack.c.1.s8 %v603_v13 }
  0x33   : > { %v1993_v44 = vcvt.s32.f32 %v619_v31 }
  0x34   : > { %440 = vadd.xlane.f32.xlu0 %v418_v35  ;;  %v634_v35 = vunpack.c.1.s8 %v606_v22 }
  0x35   : > { %442 = vadd.xlane.f32.xlu1 %v419_v36  ;;  %v635_v36 = vunpack.c.1.s8 %v1971_v23 }
  0x36   : > { %v2002_v50 = vcvt.s32.f32 %v634_v35 }
  0x37   : > { %v2004_v54 = vcvt.s32.f32 %v635_v36 }
  0x38   : > { %456 = vadd.xlane.f32.xlu0 %v426_v39  ;;  %v622_v39 = vunpack.c.3.s8 %v602_v12 }
  0x39   : > { %458 = vadd.xlane.f32.xlu1 %v427_v40  ;;  %v1985_v40 = vcvt.s32.f32 %v631_v24 }
  0x3a   : > { %v2010_v57 = vcvt.s32.f32 %v622_v39 }
  0xa9   : > { %v429_v52 = vpop.xlane.xlu0 %428 }
  0xaa   : > { %v445_v53 = vpop.xlane.xlu1 %444  ;;  %v472_v58 = vadd.f32 %v1941_v60, %v429_v52  ;;  %v473_v59 = vadd.f32 %v1943_v4, %v429_v52 }
  0xab   : > { %v488_v61 = vadd.f32 %v1941_v60, %v445_v53  ;;  %v489_v62 = vadd.f32 %v1943_v4, %v445_v53 }
  0xac   : > { %v536_v3 = vmul.f32 0.2, %v472_v58  ;;  %v537_v9 = vmul.f32 0.2, %v473_v59  ;;  %vm504_vm6 = vcmp.gt.f32.partialorder %v472_v58, 0.0  ;;  %vm505_vm7 = vcmp.gt.f32.partialorder %v473_v59, 0.0 }
  0xad   : > { %v552_v10 = vmul.f32 0.2, %v488_v61  ;;  %v553_v12 = vmul.f32 0.2, %v489_v62  ;;  %v431_v13 = vpop.xlane.xlu0 %430  ;;  %vm520_vm8 = vcmp.gt.f32.partialorder %v488_v61, 0.0  ;;  %vm521_vm10 = vcmp.gt.f32.partialorder %v489_v62, 0.0 }
  0xae   : > { %v447_v17 = vpop.xlane.xlu1 %446  ;;  %v474_v22 = vadd.f32 %v1941_v60, %v431_v13  ;;  %v475_v24 = vadd.f32 %v1943_v4, %v431_v13  ;;  %v568_v26 = vsel %vm504_vm6, %v472_v58, %v536_v3  ;;  %v569_v27 = vsel %vm505_vm7, %v473_v59, %v537_v9 }
  0xaf   : > { %v490_v25 = vadd.f32 %v1941_v60, %v447_v17  ;;  %v491_v23 = vadd.f32 %v1943_v4, %v447_v17  ;;  %v584_v31 = vsel %vm520_vm8, %v488_v61, %v552_v10  ;;  %v585_v36 = vsel %vm521_vm10, %v489_v62, %v553_v12 }
  0xb0   : > { %v538_v33 = vmul.f32 0.2, %v474_v22  ;;  %v539_v34 = vmul.f32 0.2, %v475_v24  ;;  %v2035_v39 = vsel %vm672_vm0, %v568_v26, -9e+15 }
  0xb1   : > { %v554_v35 = vmul.f32 0.2, %v490_v25  ;;  %v555_v37 = vmul.f32 0.2, %v491_v23  ;;  %v433_v38 = vpop.xlane.xlu0 %432  ;;  %v2039_v45 = vsel %vm673_vm1, %v569_v27, -9e+15 }
  0xb2   : > { %v435_v46 = vpop.xlane.xlu1 %434  ;;  %v476_v51 = vadd.f32 %v1941_v60, %v433_v38  ;;  %v477_v52 = vadd.f32 %v1943_v4, %v433_v38  ;;  %v736_v53 = vmax.f32 %v2035_v39, %v2039_v45  ;;  %v2057_v58 = vsel %vm688_vm2, %v584_v31, -9e+15 }
  0xb3   : > { %v2049_v5 = vadd.f32 %v1941_v60, %v435_v46  ;;  %v2053_v6 = vadd.f32 %v1943_v4, %v435_v46  ;;  %v2061_v59 = vsel %vm689_vm3, %v585_v36, -9e+15  ;;  %vm506_vm14 = vcmp.gt.f32.partialorder %v474_v22, 0.0 }
  0xb4   : > { %v540_v61 = vmul.f32 0.2, %v476_v51  ;;  %v541_v62 = vmul.f32 0.2, %v477_v52  ;;  %737 = vmax.xlane.f32.xlu0 %v736_v53  ;;  %v760_v3 = vmax.f32 %v2057_v58, %v2061_v59  ;;  %vm507_vm15 = vcmp.gt.f32.partialorder %v475_v24, 0.0 }
  0xb5   : > { %v542_v2 = vmul.f32 0.2, %v2049_v5  ;;  %v543_v9 = vmul.f32 0.2, %v2053_v6  ;;  %v449_v10 = vpop.xlane.xlu0 %448  ;;  %v570_v7 = vsel %vm506_vm14, %v474_v22, %v538_v33  ;;  %vm522_vm0 = vcmp.gt.f32.partialorder %v490_v25, 0.0 }
  0xb6   : > { %v451_v12 = vpop.xlane.xlu1 %450  ;;  %vm678_vm1 = vcmp.gt.f32.partialorder %v1967_v21, 0.0  ;;  %v492_v8 = vadd.f32 %v1941_v60, %v449_v10  ;;  %v2070_v13 = vadd.f32 %v1943_v4, %v449_v10  ;;  %v571_v17 = vsel %vm507_vm15, %v475_v24, %v539_v34 }
  0xb7   : > { %v2074_v26 = vsel %vm674_vm4, %v570_v7, -9e+15  ;;  %vm679_vm2 = vcmp.gt.f32.partialorder %v1973_v28, 0.0  ;;  %vm692_vm3 = vcmp.gt.f32.partialorder %v1975_v29, 0.0  ;;  %v2080_v22 = vsel %vm675_vm5, %v571_v17, -9e+15 }
  0xb8   : > { %v2083_v27 = vadd.f32 %v1941_v60, %v451_v12  ;;  %v2086_v31 = vadd.f32 %v1943_v4, %v451_v12  ;;  %vm523_vm6 = vcmp.gt.f32.partialorder %v491_v23, 0.0  ;;  %v556_v24 = vmul.f32 0.2, %v492_v8  ;;  %761 = vmax.xlane.f32.xlu0 %v760_v3 }
  0xb9   : > { %v557_v14 = vmul.f32 0.2, %v2070_v13  ;;  %v739_v33 = vmax.f32 %v2074_v26, %v2080_v22  ;;  %v586_v34 = vsel %vm522_vm0, %v490_v25, %v554_v35  ;;  %vm693_vm4 = vcmp.gt.f32.partialorder %v1977_v30, 0.0  ;;  %v437_v38 = vpop.xlane.xlu0 %436 }
  0xba   : > { %v2094_v15 = vmul.f32 0.2, %v2083_v27  ;;  %v2097_v36 = vmul.f32 0.2, %v2086_v31  ;;  %v587_v46 = vsel %vm523_vm6, %v491_v23, %v555_v37  ;;  %v2101_v53 = vsel %vm690_vm9, %v586_v34, -9e+15  ;;  %v439_v3 = vpop.xlane.xlu1 %438 }
  0xbb   : > { %740 = vmax.xlane.f32.xlu1 %v739_v33  ;;  %v2104_v10 = vadd.f32 %v1941_v60, %v437_v38  ;;  %v2107_v25 = vadd.f32 %v1943_v4, %v437_v38  ;;  %v2111_v35 = vsel %vm691_vm11, %v587_v46, -9e+15  ;;  %vm508_vm5 = vcmp.gt.f32.partialorder %v476_v51, 0.0 }
  0xbc   : > { %v763_v23 = vmax.f32 %v2101_v53, %v2111_v35  ;;  %vm509_vm7 = vcmp.gt.f32.partialorder %v477_v52, 0.0  ;;  %v572_v16 = vsel %vm508_vm5, %v476_v51, %v540_v61  ;;  %v2116_v37 = vadd.f32 %v1941_v60, %v439_v3 }
  0xbd   : > { %vm694_vm8 = vcmp.gt.f32.partialorder %v1979_v32, 0.0  ;;  %vm695_vm9 = vcmp.gt.f32.partialorder %v1985_v40, 0.0  ;;  %v544_v7 = vmul.f32 0.2, %v2104_v10  ;;  %v2122_v12 = vmul.f32 0.2, %v2107_v25  ;;  %v453_v34 = vpop.xlane.xlu0 %452 }
  0xbe   : > { %v573_v18 = vsel %vm509_vm7, %v477_v52, %v541_v62  ;;  %v2126_v17 = vsel %vm676_vm12, %v572_v16, -9e+15  ;;  %vm680_vm10 = vcmp.gt.f32.partialorder %v1987_v41, 0.0  ;;  %v2134_v61 = vadd.f32 %v1943_v4, %v439_v3  ;;  %v455_v52 = vpop.xlane.xlu1 %454 }
  0xbf   : > { %v2131_v51 = vsel %vm677_vm13, %v573_v18, -9e+15  ;;  %v2137_v33 = vmul.f32 0.2, %v2116_v37  ;;  %vm510_vm11 = vcmp.gt.f32.partialorder %v2049_v5, 0.0  ;;  %vm681_vm14 = vcmp.gt.f32.partialorder %v1989_v42, 0.0  ;;  %764 = vmax.xlane.f32.xlu1 %v763_v23 }
  0xc0   : > { %v742_v19 = vmax.f32 %v2126_v17, %v2131_v51  ;;  %v2144_v20 = vadd.f32 %v1941_v60, %v453_v34  ;;  %v2147_v62 = vadd.f32 %v1943_v4, %v453_v34  ;;  %vm511_vm12 = vcmp.gt.f32.partialorder %v2053_v6, 0.0 }
  0xc1   : > { %v2151_v38 = vmul.f32 0.2, %v2134_v61  ;;  %v574_v46 = vsel %vm510_vm11, %v2049_v5, %v542_v2  ;;  %v575_v3 = vsel %vm511_vm12, %v2053_v6, %v543_v9  ;;  %vm524_vm13 = vcmp.gt.f32.partialorder %v492_v8, 0.0  ;;  %v441_v9 = vpop.xlane.xlu0 %440 }
  0xc2   : > { %743 = vmax.xlane.f32.xlu0 %v742_v19  ;;  %v2156_v23 = vmul.f32 0.2, %v2144_v20  ;;  %v2159_v16 = vmul.f32 0.2, %v2147_v62  ;;  %v2163_v18 = vsel %vm678_vm1, %v574_v46, -9e+15  ;;  %v588_v34 = vsel %vm524_vm13, %v492_v8, %v556_v24 }
  0xc3   : > { %vm682_vm15 = vcmp.gt.f32.partialorder %v1991_v43, 0.0  ;;  %v2168_v5 = vsel %vm679_vm2, %v575_v3, -9e+15  ;;  %vm525_vm0 = vcmp.gt.f32.partialorder %v2070_v13, 0.0  ;;  %v2173_v6 = vsel %vm692_vm3, %v588_v34, -9e+15 }
  0xc4   : > { %v2176_v2 = vadd.f32 %v1941_v60, %v455_v52  ;;  %vm683_vm1 = vcmp.gt.f32.partialorder %v1993_v44, 0.0  ;;  %v745_v21 = vmax.f32 %v2163_v18, %v2168_v5  ;;  %v589_v8 = vsel %vm525_vm0, %v2070_v13, %v557_v14  ;;  %v443_v13 = vpop.xlane.xlu1 %442 }
  0xc5   : > { %v2183_v28 = vadd.f32 %v1943_v4, %v455_v52  ;;  %v2186_v24 = vadd.f32 %v1941_v60, %v441_v9  ;;  %vm696_vm2 = vcmp.gt.f32.partialorder %v1998_v48, 0.0  ;;  %vm697_vm3 = vcmp.gt.f32.partialorder %v2000_v49, 0.0 }
  0xc6   : > { %v2192_v29 = vsel %vm693_vm4, %v589_v8, -9e+15  ;;  %v2195_v19 = vmul.f32 0.2, %v2176_v2  ;;  %v2198_v46 = vadd.f32 %v1943_v4, %v441_v9  ;;  %vm526_vm6 = vcmp.gt.f32.partialorder %v2083_v27, 0.0  ;;  %746 = vmax.xlane.f32.xlu1 %v745_v21  ;;  %v457_v21 = vpop.xlane.xlu0 %456 }
  0xc7   : > { %v766_v14 = vmax.f32 %v2173_v6, %v2192_v29  ;;  %v2204_v52 = vmul.f32 0.2, %v2183_v28  ;;  %v2207_v30 = vmul.f32 0.2, %v2186_v24  ;;  %vm527_vm4 = vcmp.gt.f32.partialorder %v2086_v31, 0.0 }
  0xc8   : > { %v2211_v3 = vmul.f32 0.2, %v2198_v46  ;;  %v590_v34 = vsel %vm526_vm6, %v2083_v27, %v2094_v15  ;;  %v591_v9 = vsel %vm527_vm4, %v2086_v31, %v2097_v36  ;;  %vm512_vm5 = vcmp.gt.f32.partialorder %v2104_v10, 0.0  ;;  %v459_v42 = vpop.xlane.xlu1 %458 }
  0xc9   : > { %vm698_vm7 = vcmp.gt.f32.partialorder %v2002_v50, 0.0  ;;  %vm699_vm11 = vcmp.gt.f32.partialorder %v2004_v54, 0.0  ;;  %767 = vmax.xlane.f32.xlu0 %v766_v14  ;;  %v2222_v8 = vsel %vm694_vm8, %v590_v34, -9e+15  ;;  %v2226_v27 = vsel %vm695_vm9, %v591_v9, -9e+15 }
  0xca   : > { %vm513_vm12 = vcmp.gt.f32.partialorder %v2107_v25, 0.0  ;;  %v576_v31 = vsel %vm512_vm5, %v2104_v10, %v544_v7  ;;  %vm684_vm13 = vcmp.gt.f32.partialorder %v2006_v55, 0.0  ;;  %v769_v15 = vmax.f32 %v2222_v8, %v2226_v27  ;;  %v1651_v14 = vld [vmem:[%s1901_s6 + $0x58] sm:$0xff]  }
  0xcb   : > { %v577_v36 = vsel %vm513_vm12, %v2107_v25, %v2122_v12  ;;  %v2237_v32 = vsel %vm680_vm10, %v576_v31, -9e+15  ;;  %v2240_v40 = vadd.f32 %v1941_v60, %v443_v13  ;;  %vm685_vm8 = vcmp.gt.f32.partialorder %v2008_v56, 0.0  ;;  %v1652_v34 = vld [vmem:[%s1901_s6 + $0x18] sm:$0xff]   ;;  %1531 = vmatprep.subr.bf16.mxu0 %v1651_v14  ;;  %1592 = vmatprep.subr.bf16.mxu1 %v1651_v14  ;;  %v1655_v56 = vld [vmem:[%s1901_s6 + $0x68] sm:$0xff]  }
  0xcc   : > { %v2247_v10 = vsel %vm681_vm14, %v577_v36, -9e+15  ;;  %v2250_v7 = vadd.f32 %v1943_v4, %v443_v13  ;;  %v2253_v25 = vadd.f32 %v1941_v60, %v457_v21  ;;  %v2256_v41 = vadd.f32 %v1943_v4, %v457_v21  ;;  %770 = vmax.xlane.f32.xlu1 %v769_v15  ;;  %1532 = vmatpush3.bf16.msra.mxu0 %v1652_v34 }
  0xcd   : > { %2561 = vst [vmem:[#allocation2_spill] sm:$0xff] %v2247_v10  ;;  %vm686_vm9 = vcmp.gt.f32.partialorder %v2010_v57, 0.0  ;;  %v748_v12 = vmax.f32 %v2237_v32, %v2247_v10  ;;  %v550_v9 = vmul.f32 0.2, %v2240_v40  ;;  %vm514_vm10 = vcmp.gt.f32.partialorder %v2116_v37, 0.0  ;;  %1600 = vmatpush3.bf16.msra.mxu1 %v1652_v34 }
  0xce   : > { %vm515_vm14 = vcmp.gt.f32.partialorder %v2134_v61, 0.0  ;;  %vm687_vm0 = vcmp.gt.f32.partialorder %v2017_v63, 0.0  ;;  %v551_v13 = vmul.f32 0.2, %v2250_v7  ;;  %v564_v21 = vmul.f32 0.2, %v2253_v25 }
  0xcf   : > { %v565_v31 = vmul.f32 0.2, %v2256_v41  ;;  %v578_v15 = vsel %vm514_vm10, %v2116_v37, %v2137_v33  ;;  %vm700_vm6 = vcmp.gt.f32.partialorder %v2019_v0, 0.0  ;;  %vm701_vm4 = vcmp.gt.f32.partialorder %v2021_v1, 0.0  ;;  %749 = vmax.xlane.f32.xlu0 %v748_v12 }
  0xd0   : > { %v579_v36 = vsel %vm515_vm14, %v2134_v61, %v2151_v38  ;;  %v2276_v10 = vsel %vm682_vm15, %v578_v15, -9e+15  ;;  %vm528_vm5 = vcmp.gt.f32.partialorder %v2144_v20, 0.0  ;;  %vm529_vm12 = vcmp.gt.f32.partialorder %v2147_v62, 0.0  ;;  %v1659_v15 = vld [vmem:[%s1901_s6 + $0x78] sm:$0xff]  }
  0xd1   : > { %v2282_v37 = vsel %vm683_vm1, %v579_v36, -9e+15  ;;  %v592_v33 = vsel %vm528_vm5, %v2144_v20, %v2156_v23  ;;  %v593_v61 = vsel %vm529_vm12, %v2147_v62, %v2159_v16  ;;  %v502_v43 = vadd.f32 %v1941_v60, %v459_v42  ;;  %v1653_v62 = vld [vmem:[%s1901_s6 + $0x60] sm:$0xff]  }
  0xd2   : > { %vm702_vm15 = vcmp.gt.f32.partialorder %v2025_v11, 0.0  ;;  %vm703_vm10 = vcmp.gt.f32.partialorder %v2042_v47, 0.0  ;;  %v751_v38 = vmax.f32 %v2276_v10, %v2282_v37  ;;  %v2295_v44 = vsel %vm696_vm2, %v592_v33, -9e+15  ;;  %v1654_v23 = vld [vmem:[%s1901_s6 + $0x20] sm:$0xff]   ;;  %1533 = vmatprep.subr.bf16.mxu0 %v1653_v62  ;;  %1593 = vmatprep.subr.bf16.mxu1 %v1653_v62  ;;  %v1660_v11 = vld [vmem:[%s1901_s6 + $0x38] sm:$0xff]  }
  0xd3   : > { %v2299_v14 = vsel %vm697_vm3, %v593_v61, -9e+15  ;;  %v503_v20 = vadd.f32 %v1943_v4, %v459_v42  ;;  %v566_v16 = vmul.f32 0.2, %v502_v43  ;;  %vm530_vm1 = vcmp.gt.f32.partialorder %v2176_v2, 0.0  ;;  %1534 = vmatpush3.bf16.msra.mxu0 %v1654_v23  ;;  %1601 = vmatpush3.bf16.msra.mxu1 %v1654_v23 }
  0xd4   : > { %v772_v60 = vmax.f32 %v2295_v44, %v2299_v14  ;;  %vm531_vm14 = vcmp.gt.f32.partialorder %v2183_v28, 0.0  ;;  %752 = vmax.xlane.f32.xlu1 %v751_v38  ;;  %v594_v34 = vsel %vm530_vm1, %v2176_v2, %v2195_v19  ;;  %vm516_vm2 = vcmp.gt.f32.partialorder %v2186_v24, 0.0  ;;  %1535 = vmatprep.subr.bf16.mxu0 %v1655_v56 }
  0xd5   : > { %v567_v48 = vmul.f32 0.2, %v503_v20  ;;  %v595_v49 = vsel %vm531_vm14, %v2183_v28, %v2204_v52  ;;  %v2315_v4 = vsel %vm698_vm7, %v594_v34, -9e+15  ;;  %vm517_vm3 = vcmp.gt.f32.partialorder %v2198_v46, 0.0  ;;  %1594 = vmatprep.subr.bf16.mxu1 %v1655_v56 }
  0xd6   : > { %773 = vmax.xlane.f32.xlu0 %v772_v60  ;;  %v2319_v12 = vsel %vm699_vm11, %v595_v49, -9e+15  ;;  %v580_v2 = vsel %vm516_vm2, %v2186_v24, %v2207_v30  ;;  %v581_v50 = vsel %vm517_vm3, %v2198_v46, %v2211_v3  ;;  %vm518_vm7 = vcmp.gt.f32.partialorder %v2240_v40, 0.0  ;;  %v1656_v30 = vld [vmem:[%s1901_s6 + $0x28] sm:$0xff]  }
  0xd7   : > { %v775_v28 = vmax.f32 %v2315_v4, %v2319_v12  ;;  %v2330_v19 = vsel %vm684_vm13, %v580_v2, -9e+15  ;;  %v2335_v54 = vsel %vm685_vm8, %v581_v50, -9e+15  ;;  %vm519_vm11 = vcmp.gt.f32.partialorder %v2250_v7, 0.0  ;;  %1536 = vmatpush3.bf16.msra.mxu0 %v1656_v30  ;;  %1602 = vmatpush3.bf16.msra.mxu1 %v1656_v30 }
  0xd8   : > { %v582_v24 = vsel %vm518_vm7, %v2240_v40, %v550_v9  ;;  %vm532_vm5 = vcmp.gt.f32.partialorder %v2253_v25, 0.0  ;;  %v754_v55 = vmax.f32 %v2330_v19, %v2335_v54  ;;  %v583_v46 = vsel %vm519_vm11, %v2250_v7, %v551_v13  ;;  %v1657_v13 = vld [vmem:[%s1901_s6 + $0x70] sm:$0xff]  }
  0xd9   : > { %776 = vmax.xlane.f32.xlu1 %v775_v28  ;;  %v2345_v52 = vsel %vm686_vm9, %v582_v24, -9e+15  ;;  %vm533_vm13 = vcmp.gt.f32.partialorder %v2256_v41, 0.0  ;;  %v2352_v3 = vsel %vm687_vm0, %v583_v46, -9e+15  ;;  %v596_v40 = vsel %vm532_vm5, %v2253_v25, %v564_v21  ;;  %v1658_v21 = vld [vmem:[%s1901_s6 + $0x30] sm:$0xff]   ;;  %1537 = vmatprep.subr.bf16.mxu0 %v1657_v13 }
  0xda   : > { %v597_v9 = vsel %vm533_vm13, %v2256_v41, %v565_v31  ;;  %vm534_vm8 = vcmp.gt.f32.partialorder %v502_v43, 0.0  ;;  %755 = vmax.xlane.f32.xlu0 %v754_v55  ;;  %v757_v57 = vmax.f32 %v2345_v52, %v2352_v3  ;;  %v2360_v7 = vsel %vm700_vm6, %v596_v40, -9e+15  ;;  %1595 = vmatprep.subr.bf16.mxu1 %v1657_v13 }
  0xdb   : > { %v2364_v63 = vsel %vm701_vm4, %v597_v9, -9e+15  ;;  %vm535_vm9 = vcmp.gt.f32.partialorder %v503_v20, 0.0  ;;  %v598_v41 = vsel %vm534_vm8, %v502_v43, %v566_v16  ;;  %1538 = vmatpush3.bf16.msra.mxu0 %v1658_v21  ;;  %1603 = vmatpush3.bf16.msra.mxu1 %v1658_v21 }
  0xdc   : > { %v778_v25 = vmax.f32 %v2360_v7, %v2364_v63  ;;  %v599_v42 = vsel %vm535_vm9, %v503_v20, %v567_v48  ;;  %v2370_v0 = vsel %vm702_vm15, %v598_v41, -9e+15  ;;  %1539 = vmatprep.subr.bf16.mxu0 %v1659_v15  ;;  %1596 = vmatprep.subr.bf16.mxu1 %v1659_v15 }
  0xdd   : > { %758 = vmax.xlane.f32.xlu1 %v757_v57  ;;  %v2374_v1 = vsel %vm703_vm10, %v599_v42, -9e+15 }
  0xde   : > { %779 = vmax.xlane.f32.xlu0 %v778_v25  ;;  %v781_v31 = vmax.f32 %v2370_v0, %v2374_v1 }
  0xdf   : > { %1540 = vmatpush3.bf16.msra.mxu0 %v1660_v11  ;;  %1604 = vmatpush3.bf16.msra.mxu1 %v1660_v11 }
  0xe1   : > { %782 = vmax.xlane.f32.xlu1 %v781_v31 }
 0x141   : > { %v738_v47 = vpop.xlane.xlu0 %737 }
 0x142   : > { %v784_v36 = vsub.f32 %v2035_v39, %v738_v47  ;;  %v785_v33 = vsub.f32 %v2039_v45, %v738_v47 }
 0x144   : > { %v816_v61 = vmul.f32 1.442695, %v784_v36  ;;  %v818_v43 = vmul.f32 1.442695, %v785_v33 }
 0x145   : > { %v762_v38 = vpop.xlane.xlu0 %761 }
 0x146   : > { %1661 = vpow2.f32 %v816_v61  ;;  %v800_v20 = vsub.f32 %v2057_v58, %v762_v38  ;;  %v801_v23 = vsub.f32 %v2061_v59, %v762_v38 }
 0x147   : > { %1663 = vpow2.f32 %v818_v43 }
 0x148   : > { %v741_v62 = vpop.xlane.xlu1 %740  ;;  %v848_v48 = vmul.f32 1.442695, %v800_v20  ;;  %v850_v39 = vmul.f32 1.442695, %v801_v23  ;;  %v2562_v20 = vld [vmem:[#allocation2_spill] sm:$0xff] }
 0x149   : > { %v786_v60 = vsub.f32 %v2074_v26, %v741_v62  ;;  %v787_v16 = vsub.f32 %v2080_v22, %v741_v62 }
 0x14a   : > { %1665 = vpow2.f32 %v848_v48 }
 0x14b   : > { %v820_v34 = vmul.f32 1.442695, %v786_v60  ;;  %v822_v49 = vmul.f32 1.442695, %v787_v16 }
 0x14c   : > { %v765_v45 = vpop.xlane.xlu1 %764 }
 0x14d   : > { %1667 = vpow2.f32 %v820_v34  ;;  %v802_v2 = vsub.f32 %v2101_v53, %v765_v45  ;;  %v803_v28 = vsub.f32 %v2111_v35, %v765_v45 }
 0x14e   : > { %1669 = vpow2.f32 %v822_v49 }
 0x14f   : > { %v744_v58 = vpop.xlane.xlu0 %743  ;;  %v852_v50 = vmul.f32 1.442695, %v802_v2  ;;  %v854_v24 = vmul.f32 1.442695, %v803_v28  ;;  %1671 = vpow2.f32 %v850_v39 }
 0x150   : > { %v788_v59 = vsub.f32 %v2126_v17, %v744_v58  ;;  %v789_v26 = vsub.f32 %v2131_v51, %v744_v58  ;;  %v1662_v22 = vpop.eup %1661 }
 0x151   : > { %1673 = vpow2.f32 %v852_v50  ;;  %v1664_v56 = vpop.eup %1663 }
 0x152   : > { %v824_v55 = vmul.f32 1.442695, %v788_v59  ;;  %v826_v46 = vmul.f32 1.442695, %v789_v26  ;;  %1675 = vpow2.f32 %v854_v24  ;;  %v880_v40 = vadd.f32 %v1664_v56, %v1662_v22 }
 0x153   : > { %v747_v30 = vpop.xlane.xlu1 %746 }
 0x154   : > { %1677 = vpow2.f32 %v824_v55  ;;  %v790_v53 = vsub.f32 %v2163_v18, %v747_v30  ;;  %v791_v35 = vsub.f32 %v2168_v5, %v747_v30  ;;  %881 = vadd.xlane.f32.xlu0 %v880_v40  ;;  %v2396_v41 = vpop.eup %1665 }
 0x155   : > { %1679 = vpow2.f32 %v826_v46 }
 0x156   : > { %v768_v9 = vpop.xlane.xlu0 %767  ;;  %v828_v57 = vmul.f32 1.442695, %v790_v53  ;;  %v830_v17 = vmul.f32 1.442695, %v791_v35 }
 0x157   : > { %v804_v51 = vsub.f32 %v2173_v6, %v768_v9  ;;  %v805_v25 = vsub.f32 %v2192_v29, %v768_v9  ;;  %v1668_v42 = vpop.eup %1667 }
 0x158   : > { %1681 = vpow2.f32 %v828_v57  ;;  %v1670_v18 = vpop.eup %1669  ;;  %v960_v11 = vpack.c.bf16 %v1668_v42, %v1662_v22 }
 0x159   : > { %v856_v13 = vmul.f32 1.442695, %v804_v51  ;;  %v858_v21 = vmul.f32 1.442695, %v805_v25  ;;  %v771_v31 = vpop.xlane.xlu1 %770  ;;  %1683 = vpow2.f32 %v830_v17  ;;  %v883_v36 = vadd.f32 %v1670_v18, %v1668_v42  ;;  %v2400_v33 = vpop.eup %1671 }
 0x15a   : > { %v806_v5 = vsub.f32 %v2222_v8, %v771_v31  ;;  %v807_v15 = vsub.f32 %v2226_v27, %v771_v31  ;;  %v961_v6 = vpack.c.bf16 %v1670_v18, %v1664_v56 }
 0x15b   : > { %1685 = vpow2.f32 %v856_v13  ;;  %v2403_v38 = vpop.eup %1673  ;;  %884 = vadd.xlane.f32.xlu1 %v883_v36 }
 0x15c   : > { %v750_v47 = vpop.xlane.xlu0 %749  ;;  %v860_v29 = vmul.f32 1.442695, %v806_v5  ;;  %v862_v61 = vmul.f32 1.442695, %v807_v15  ;;  %1687 = vpow2.f32 %v858_v21  ;;  %1104 = vmatprep.mubr.bf16.mxu0 %v961_v6  ;;  %v2406_v8 = vpop.eup %1675  ;;  %v968_v23 = vpack.c.bf16 %v2403_v38, %v2396_v41 }
 0x15d   : > { %v792_v43 = vsub.f32 %v2237_v32, %v750_v47  ;;  %v793_v62 = vsub.f32 %v2562_v20, %v750_v47  ;;  %1105 = vmatmul.mubr.bf16.vlgmr.msra.gmra.mrb[0].mxu0 %v960_v11  ;;  %v969_v32 = vpack.c.bf16 %v2406_v8, %v2400_v33 }
 0x15e   : > { %1689 = vpow2.f32 %v860_v29  ;;  %v1678_v60 = vpop.eup %1677 }
 0x15f   : > { %v832_v27 = vmul.f32 1.442695, %v792_v43  ;;  %1691 = vpow2.f32 %v862_v61  ;;  %v834_v16 = vmul.f32 1.442695, %v793_v62  ;;  %v1680_v34 = vpop.eup %1679  ;;  %1136 = vmatprep.mubr.bf16.mxu1 %v969_v32 }
 0x160   : > { %v886_v58 = vadd.f32 %v1680_v34, %v1678_v60  ;;  %1137 = vmatmul.mubr.bf16.vlgmr.msra.gmra.mrb[0].mxu1 %v968_v23 }
 0x161   : > { %v753_v48 = vpop.xlane.xlu1 %752  ;;  %1693 = vpow2.f32 %v832_v27 }
 0x162   : > { %v794_v49 = vsub.f32 %v2276_v10, %v753_v48  ;;  %v795_v39 = vsub.f32 %v2282_v37, %v753_v48  ;;  %1695 = vpow2.f32 %v834_v16  ;;  %v1682_v59 = vpop.eup %1681  ;;  %887 = vadd.xlane.f32.xlu0 %v886_v58 }
 0x163   : > { %v774_v45 = vpop.xlane.xlu0 %773  ;;  %v1684_v46 = vpop.eup %1683  ;;  %v962_v56 = vpack.c.bf16 %v1682_v59, %v1678_v60 }
 0x164   : > { %v808_v2 = vsub.f32 %v2295_v44, %v774_v45  ;;  %v809_v28 = vsub.f32 %v2299_v14, %v774_v45  ;;  %v836_v50 = vmul.f32 1.442695, %v794_v49  ;;  %v838_v24 = vmul.f32 1.442695, %v795_v39 }
 0x165   : > { %v889_v14 = vadd.f32 %v1684_v46, %v1682_v59  ;;  %v963_v30 = vpack.c.bf16 %v1684_v46, %v1680_v34  ;;  %v2418_v53 = vpop.eup %1685 }
 0x166   : > { %v864_v26 = vmul.f32 1.442695, %v808_v2  ;;  %v866_v22 = vmul.f32 1.442695, %v809_v28  ;;  %v777_v55 = vpop.xlane.xlu1 %776  ;;  %1697 = vpow2.f32 %v836_v50  ;;  %v2421_v57 = vpop.eup %1687 }
 0x167   : > { %v810_v10 = vsub.f32 %v2315_v4, %v777_v55  ;;  %v811_v37 = vsub.f32 %v2319_v12, %v777_v55  ;;  %1699 = vpow2.f32 %v838_v24  ;;  %v756_v44 = vpop.xlane.xlu0 %755  ;;  %890 = vadd.xlane.f32.xlu1 %v889_v14  ;;  %1112 = vmatprep.mubr.bf16.mxu0 %v963_v30  ;;  %v904_v55 = vadd.f32 %v2400_v33, %v2396_v41 }
 0x168   : > { %1701 = vpow2.f32 %v864_v26  ;;  %v796_v9 = vsub.f32 %v2330_v19, %v756_v44  ;;  %v797_v17 = vsub.f32 %v2335_v54, %v756_v44  ;;  %v2424_v12 = vpop.eup %1689  ;;  %1113 = vmatmul.mubr.bf16.gmra.mrb[4].mxu0 %v962_v56  ;;  %v910_v44 = vadd.f32 %v2421_v57, %v2418_v53 }
 0x169   : > { %v868_v35 = vmul.f32 1.442695, %v810_v10  ;;  %v870_v40 = vmul.f32 1.442695, %v811_v37  ;;  %1703 = vpow2.f32 %v866_v22  ;;  %v2428_v13 = vpop.eup %1691  ;;  %v970_v54 = vpack.c.bf16 %v2424_v12, %v2418_v53 }
 0x16a   : > { %v759_v4 = vpop.xlane.xlu1 %758  ;;  %v840_v51 = vmul.f32 1.442695, %v796_v9  ;;  %v842_v19 = vmul.f32 1.442695, %v797_v17  ;;  %v971_v47 = vpack.c.bf16 %v2428_v13, %v2421_v57  ;;  %v907_v37 = vadd.f32 %v2406_v8, %v2403_v38 }
 0x16b   : > { %1705 = vpow2.f32 %v868_v35  ;;  %v798_v25 = vsub.f32 %v2345_v52, %v759_v4  ;;  %v799_v42 = vsub.f32 %v2352_v3, %v759_v4  ;;  %v780_v21 = vpop.xlane.xlu0 %779  ;;  %v1694_v31 = vpop.eup %1693  ;;  %v913_v14 = vadd.f32 %v2428_v13, %v2424_v12 }
 0x16c   : > { %1707 = vpow2.f32 %v870_v40  ;;  %v812_v15 = vsub.f32 %v2360_v7, %v780_v21  ;;  %v1696_v11 = vpop.eup %1695  ;;  %v813_v52 = vsub.f32 %v2364_v63, %v780_v21  ;;  %1144 = vmatprep.mubr.bf16.mxu1 %v971_v47 }
 0x16d   : > { %1709 = vpow2.f32 %v840_v51  ;;  %v844_v18 = vmul.f32 1.442695, %v798_v25  ;;  %v846_v5 = vmul.f32 1.442695, %v799_v42  ;;  %v892_v43 = vadd.f32 %v1696_v11, %v1694_v31  ;;  %1145 = vmatmul.mubr.bf16.gmra.mrb[4].mxu1 %v970_v54 }
 0x16e   : > { %1711 = vpow2.f32 %v842_v19  ;;  %v783_v3 = vpop.xlane.xlu1 %782  ;;  %v872_v36 = vmul.f32 1.442695, %v812_v15  ;;  %v874_v61 = vmul.f32 1.442695, %v813_v52 }
 0x16f   : > { %1713 = vpow2.f32 %v844_v18  ;;  %v814_v6 = vsub.f32 %v2370_v0, %v783_v3  ;;  %v815_v29 = vsub.f32 %v2374_v1, %v783_v3  ;;  %893 = vadd.xlane.f32.xlu0 %v892_v43 }
 0x170   : > { %1715 = vpow2.f32 %v846_v5  ;;  %v1698_v20 = vpop.eup %1697 }
 0x171   : > { %1717 = vpow2.f32 %v872_v36  ;;  %v876_v7 = vmul.f32 1.442695, %v814_v6  ;;  %v878_v62 = vmul.f32 1.442695, %v815_v29  ;;  %v1700_v63 = vpop.eup %1699  ;;  %v964_v27 = vpack.c.bf16 %v1698_v20, %v1694_v31 }
 0x172   : > { %1719 = vpow2.f32 %v874_v61  ;;  %v1702_v23 = vpop.eup %1701  ;;  %v895_v60 = vadd.f32 %v1700_v63, %v1698_v20  ;;  %v965_v16 = vpack.c.bf16 %v1700_v63, %v1696_v11 }
 0x173   : > { %1721 = vpow2.f32 %v876_v7  ;;  %v1704_v0 = vpop.eup %1703 }
 0x174   : > { %1723 = vpow2.f32 %v878_v62  ;;  %896 = vadd.xlane.f32.xlu1 %v895_v60  ;;  %1120 = vmatprep.mubr.bf16.mxu0 %v965_v16  ;;  %v916_v41 = vadd.f32 %v1704_v0, %v1702_v23 }
 0x175   : > { %v1706_v1 = vpop.eup %1705  ;;  %1121 = vmatmul.mubr.bf16.gmra.mrb[8].mxu0 %v964_v27 }
 0x176   : > { %v1708_v48 = vpop.eup %1707  ;;  %v972_v32 = vpack.c.bf16 %v1706_v1, %v1702_v23 }
 0x177   : > { %v1710_v34 = vpop.eup %1709  ;;  %v973_v49 = vpack.c.bf16 %v1708_v48, %v1704_v0  ;;  %v919_v33 = vadd.f32 %v1708_v48, %v1706_v1 }
 0x178   : > { %v1712_v39 = vpop.eup %1711 }
 0x179   : > { %v1714_v45 = vpop.eup %1713  ;;  %1152 = vmatprep.mubr.bf16.mxu1 %v973_v49  ;;  %v898_v2 = vadd.f32 %v1712_v39, %v1710_v34 }
 0x17a   : > { %v1716_v28 = vpop.eup %1715  ;;  %1153 = vmatmul.mubr.bf16.gmra.mrb[8].mxu1 %v972_v32  ;;  %v966_v58 = vpack.c.bf16 %v1714_v45, %v1710_v34 }
 0x17b   : > { %v1718_v50 = vpop.eup %1717  ;;  %899 = vadd.xlane.f32.xlu0 %v898_v2  ;;  %v901_v24 = vadd.f32 %v1716_v28, %v1714_v45  ;;  %v967_v59 = vpack.c.bf16 %v1716_v28, %v1712_v39 }
 0x17c   : > { %v1720_v26 = vpop.eup %1719 }
 0x17d   : > { %v1722_v22 = vpop.eup %1721  ;;  %902 = vadd.xlane.f32.xlu1 %v901_v24  ;;  %1128 = vmatprep.mubr.bf16.mxu0 %v967_v59  ;;  %v922_v30 = vadd.f32 %v1720_v26, %v1718_v50 }
 0x17e   : > { %v1724_v46 = vpop.eup %1723  ;;  %1129 = vmatmul.mubr.bf16.gmra.mrb[12].mxu0 %v966_v58  ;;  %v974_v10 = vpack.c.bf16 %v1722_v22, %v1718_v50 }
 0x17f   : > { %905 = vadd.xlane.f32.xlu0 %v904_v55  ;;  %v975_v56 = vpack.c.bf16 %v1724_v46, %v1720_v26  ;;  %v925_v35 = vadd.f32 %v1724_v46, %v1722_v22 }
 0x181   : > { %908 = vadd.xlane.f32.xlu1 %v907_v37  ;;  %1160 = vmatprep.mubr.bf16.mxu1 %v975_v56 }
 0x182   : > { %1161 = vmatmul.mubr.bf16.gmra.mrb[12].mxu1 %v974_v10 }
 0x183   : > { %911 = vadd.xlane.f32.xlu0 %v910_v44 }
 0x185   : > { %914 = vadd.xlane.f32.xlu1 %v913_v14 }
 0x187   : > { %917 = vadd.xlane.f32.xlu0 %v916_v41 }
 0x189   : > { %920 = vadd.xlane.f32.xlu1 %v919_v33 }
 0x18b   : > { %923 = vadd.xlane.f32.xlu0 %v922_v30 }
 0x18d   : > { %926 = vadd.xlane.f32.xlu1 %v925_v35 }
 0x1e1   : > { %v882_v38 = vpop.xlane.xlu0 %881 }
 0x1e2   : > { %1725 = vrcp.f32 %v882_v38 }
 0x1e8   : > { %v885_v8 = vpop.xlane.xlu1 %884 }
 0x1e9   : > { %1727 = vrcp.f32 %v885_v8 }
 0x1ec   : > { %v1726_v21 = vpop.eup %1725 }
 0x1ef   : > { %v888_v40 = vpop.xlane.xlu0 %887 }
 0x1f3   : > { %v1728_v15 = vpop.eup %1727 }
 0x1f4   : > { %v891_v9 = vpop.xlane.xlu1 %890 }
 0x1fc   : > { %v894_v53 = vpop.xlane.xlu0 %893 }
 0x201   : > { %v897_v57 = vpop.xlane.xlu1 %896 }
 0x208   : > { %v2446_v17 = vpop.xlane.xlu0 %899 }
 0x20a   : > { %v2448_v4 = vpop.xlane.xlu1 %902 }
 0x20c   : > { %v906_v12 = vpop.xlane.xlu0 %905 }
 0x20d   : > { %1729 = vrcp.f32 %v906_v12 }
 0x20e   : > { %v909_v51 = vpop.xlane.xlu1 %908 }
 0x20f   : > { %1731 = vrcp.f32 %v909_v51 }
 0x210   : > { %1733 = vrcp.f32 %v888_v40  ;;  %v912_v52 = vpop.xlane.xlu0 %911 }
 0x211   : > { %1735 = vrcp.f32 %v891_v9 }
 0x212   : > { %v915_v43 = vpop.xlane.xlu1 %914  ;;  %1737 = vrcp.f32 %v912_v52 }
 0x214   : > { %v918_v50 = vpop.xlane.xlu0 %917 }
 0x216   : > { %v921_v59 = vpop.xlane.xlu1 %920 }
 0x217   : > { %v1730_v29 = vpop.eup %1729 }
 0x218   : > { %v924_v40 = vpop.xlane.xlu0 %923 }
 0x219   : > { %v1732_v27 = vpop.eup %1731 }
 0x21a   : > { %v1734_v49 = vpop.eup %1733 }
 0x21b   : > { %v1736_v58 = vpop.eup %1735 }
 0x21c   : > { %v1738_v14 = vpop.eup %1737 }
 0x230   : > { %v1541_v25 = vpop.f32.mrb[0].mxu0 }
 0x231   : > { %v1542_v42 = vpop.f32.mrb[1].mxu0 }
 0x232   : > { %v1543_v13 = vadd.f32 %v1542_v42, %v1541_v25  ;;  %v1544_v19 = vpop.f32.mrb[2].mxu0 }
 0x233   : > { %v1545_v54 = vpop.f32.mrb[3].mxu0  ;;  %v1565_v5 = vpop.f32.mrb[0].mxu1 }
 0x234   : > { %v2450_v31 = vmul.f32 %v1726_v21, %v1543_v13  ;;  %v1546_v18 = vadd.f32 %v1545_v54, %v1544_v19  ;;  %v1566_v11 = vpop.f32.mrb[1].mxu1 }
 0x235   : > { %v1567_v36 = vadd.f32 %v1566_v11, %v1565_v5  ;;  %v1568_v6 = vpop.f32.mrb[2].mxu1 }
 0x236   : > { %v1201_v3 = vmin.f32 %v2450_v31, 0.0  ;;  %v2453_v47 = vmul.f32 %v1728_v15, %v1546_v18  ;;  %v1569_v61 = vpop.f32.mrb[3].mxu1  ;;  %vm1185_vm0 = vcmp.gt.f32.partialorder %v2450_v31, 0.0  ;;  %v927_v18 = vpop.xlane.xlu1 %926 }
 0x237   : > { %v2456_v62 = vmul.f32 %v1730_v29, %v1567_v36  ;;  %v1570_v63 = vadd.f32 %v1569_v61, %v1568_v6 }
 0x238   : > { %v1217_v20 = vmul.f32 1.442695, %v1201_v3  ;;  %v1202_v7 = vmin.f32 %v2453_v47, 0.0  ;;  %vm1186_vm6 = vcmp.gt.f32.partialorder %v2453_v47, 0.0 }
 0x239   : > { %v1209_v60 = vmin.f32 %v2456_v62, 0.0  ;;  %v2459_v0 = vmul.f32 %v1732_v27, %v1570_v63  ;;  %vm1193_vm4 = vcmp.gt.f32.partialorder %v2456_v62, 0.0 }
 0x23a   : > { %1739 = vpow2.f32 %v1217_v20  ;;  %v1219_v23 = vmul.f32 1.442695, %v1202_v7 }
 0x23b   : > { %v1547_v16 = vpop.f32.mrb[4].mxu0  ;;  %1741 = vrcp.f32 %v915_v43  ;;  %v1233_v48 = vmul.f32 1.442695, %v1209_v60  ;;  %v1210_v39 = vmin.f32 %v2459_v0, 0.0  ;;  %vm1194_vm12 = vcmp.gt.f32.partialorder %v2459_v0, 0.0 }
 0x23c   : > { %v1548_v1 = vpop.f32.mrb[5].mxu0  ;;  %1743 = vpow2.f32 %v1219_v23 }
 0x23d   : > { %v1549_v32 = vadd.f32 %v1548_v1, %v1547_v16  ;;  %v1550_v34 = vpop.f32.mrb[6].mxu0  ;;  %1745 = vrcp.f32 %v894_v53  ;;  %v1235_v24 = vmul.f32 1.442695, %v1210_v39 }
 0x23e   : > { %v1551_v45 = vpop.f32.mrb[7].mxu0  ;;  %1747 = vpow2.f32 %v1233_v48 }
 0x23f   : > { %v2462_v2 = vmul.f32 %v1734_v49, %v1549_v32  ;;  %v1552_v28 = vadd.f32 %v1551_v45, %v1550_v34  ;;  %1749 = vrcp.f32 %v897_v57 }
 0x240   : > { %v1571_v55 = vpop.f32.mrb[4].mxu1  ;;  %1751 = vpow2.f32 %v1235_v24 }
 0x241   : > { %v1203_v26 = vmin.f32 %v2462_v2, 0.0  ;;  %v2465_v22 = vmul.f32 %v1736_v58, %v1552_v28  ;;  %v1572_v46 = vpop.f32.mrb[5].mxu1  ;;  %1753 = vrcp.f32 %v918_v50  ;;  %vm1187_vm15 = vcmp.gt.f32.partialorder %v2462_v2, 0.0 }
 0x242   : > { %v1573_v56 = vadd.f32 %v1572_v46, %v1571_v55  ;;  %v1574_v44 = vpop.f32.mrb[6].mxu1  ;;  %1755 = vrcp.f32 %v921_v59 }
 0x243   : > { %v1221_v10 = vmul.f32 1.442695, %v1203_v26  ;;  %v1204_v37 = vmin.f32 %v2465_v22, 0.0  ;;  %v1575_v41 = vpop.f32.mrb[7].mxu1  ;;  %vm1188_vm10 = vcmp.gt.f32.partialorder %v2465_v22, 0.0 }
 0x244   : > { %v1740_v33 = vpop.eup %1739  ;;  %v2469_v35 = vmul.f32 %v1738_v14, %v1573_v56  ;;  %v1576_v38 = vadd.f32 %v1575_v41, %v1574_v44 }
 0x245   : > { %1757 = vpow2.f32 %v1221_v10  ;;  %v1223_v30 = vmul.f32 1.442695, %v1204_v37  ;;  %v1742_v8 = vpop.eup %1741  ;;  %v1467_v9 = vadd.f32 -1.0, %v1740_v33 }
 0x246   : > { %1759 = vrcp.f32 %v2446_v17  ;;  %v1744_v57 = vpop.eup %1743  ;;  %v1211_v12 = vmin.f32 %v2469_v35, 0.0  ;;  %v2479_v51 = vmul.f32 %v1742_v8, %v1576_v38  ;;  %vm1195_vm1 = vcmp.gt.f32.partialorder %v2469_v35, 0.0 }
 0x247   : > { %1761 = vpow2.f32 %v1223_v30  ;;  %v1746_v42 = vpop.eup %1745  ;;  %v1265_v13 = vsel %vm1185_vm0, %v2450_v31, %v1467_v9  ;;  %v1468_v19 = vadd.f32 -1.0, %v1744_v57 }
 0x248   : > { %v1553_v53 = vpop.f32.mrb[8].mxu0  ;;  %1763 = vrcp.f32 %v2448_v4  ;;  %v1748_v54 = vpop.eup %1747  ;;  %1281 = vst [vmem:[%s2474_s28] sm:$0xff] %v1265_v13  ;;  %v1237_v5 = vmul.f32 1.442695, %v1211_v12  ;;  %v1212_v15 = vmin.f32 %v2479_v51, 0.0  ;;  %vm1196_vm14 = vcmp.gt.f32.partialorder %v2479_v51, 0.0 }
 0x249   : > { %v1554_v25 = vpop.f32.mrb[9].mxu0  ;;  %1765 = vrcp.f32 %v924_v40  ;;  %v1266_v52 = vsel %vm1186_vm6, %v2453_v47, %v1468_v19  ;;  %v1475_v3 = vadd.f32 -1.0, %v1748_v54  ;;  %v1750_v6 = vpop.eup %1749 }
 0x24a   : > { %v1555_v17 = vadd.f32 %v1554_v25, %v1553_v53  ;;  %v1556_v21 = vpop.f32.mrb[10].mxu0  ;;  %1282 = vst [vmem:[%s2474_s28 + $0x8] sm:$0xff] %v1266_v52  ;;  %1767 = vpow2.f32 %v1237_v5  ;;  %v1239_v29 = vmul.f32 1.442695, %v1212_v15  ;;  %v1752_v43 = vpop.eup %1751 }
 0x24b   : > { %v1557_v11 = vpop.f32.mrb[11].mxu0  ;;  %1769 = vrcp.f32 %v927_v18  ;;  %v1273_v20 = vsel %vm1193_vm4, %v2456_v62, %v1475_v3  ;;  %v1754_v27 = vpop.eup %1753  ;;  %v1476_v23 = vadd.f32 -1.0, %v1752_v43 }
 0x24c   : > { %v2487_v4 = vmul.f32 %v1746_v42, %v1555_v17  ;;  %v1558_v31 = vadd.f32 %v1557_v11, %v1556_v21  ;;  %1289 = vst [vmem:[%s2474_s28 + $0x40] sm:$0xff] %v1273_v20  ;;  %1771 = vpow2.f32 %v1239_v29  ;;  %v1756_v1 = vpop.eup %1755 }
 0x24d   : > { %v1577_v36 = vpop.f32.mrb[8].mxu1  ;;  %v1274_v39 = vsel %vm1194_vm12, %v2459_v0, %v1476_v23 }
 0x24e   : > { %v1578_v61 = vpop.f32.mrb[9].mxu1  ;;  %v1205_v7 = vmin.f32 %v2487_v4, 0.0  ;;  %v2493_v47 = vmul.f32 %v1750_v6, %v1558_v31  ;;  %1290 = vst [vmem:[%s2474_s28 + $0x48] sm:$0xff] %v1274_v39  ;;  %vm1189_vm2 = vcmp.gt.f32.partialorder %v2487_v4, 0.0 }
 0x24f   : > { %v1580_v63 = vpop.f32.mrb[10].mxu1  ;;  %v1579_v60 = vadd.f32 %v1578_v61, %v1577_v36  ;;  %v1758_v49 = vpop.eup %1757 }
 0x250   : > { %v1581_v16 = vpop.f32.mrb[11].mxu1  ;;  %v1225_v48 = vmul.f32 1.442695, %v1205_v7  ;;  %v1206_v32 = vmin.f32 %v2493_v47, 0.0  ;;  %v1760_v58 = vpop.eup %1759  ;;  %v1469_v50 = vadd.f32 -1.0, %v1758_v49  ;;  %vm1190_vm3 = vcmp.gt.f32.partialorder %v2493_v47, 0.0 }
 0x251   : > { %v1582_v34 = vadd.f32 %v1581_v16, %v1580_v63  ;;  %v1559_v62 = vpop.f32.mrb[12].mxu0  ;;  %v2499_v45 = vmul.f32 %v1754_v27, %v1579_v60  ;;  %v1762_v55 = vpop.eup %1761 }
 0x252   : > { %v1560_v28 = vpop.f32.mrb[13].mxu0  ;;  %1773 = vpow2.f32 %v1225_v48  ;;  %v1227_v24 = vmul.f32 1.442695, %v1206_v32  ;;  %v1764_v0 = vpop.eup %1763  ;;  %v1267_v56 = vsel %vm1187_vm15, %v2462_v2, %v1469_v50  ;;  %v1470_v44 = vadd.f32 -1.0, %v1762_v55 }
 0x253   : > { %v2502_v59 = vmul.f32 %v1756_v1, %v1582_v34  ;;  %v1562_v26 = vpop.f32.mrb[14].mxu0  ;;  %v1213_v46 = vmin.f32 %v2499_v45, 0.0  ;;  %v1561_v10 = vadd.f32 %v1560_v28, %v1559_v62  ;;  %v1766_v41 = vpop.eup %1765  ;;  %1283 = vst [vmem:[%s2474_s28 + $0x10] sm:$0xff] %v1267_v56  ;;  %vm1197_vm7 = vcmp.gt.f32.partialorder %v2499_v45, 0.0 }
 0x254   : > { %v1563_v37 = vpop.f32.mrb[15].mxu0  ;;  %1775 = vpow2.f32 %v1227_v24  ;;  %v1268_v9 = vsel %vm1188_vm10, %v2465_v22, %v1470_v44  ;;  %v1768_v2 = vpop.eup %1767 }
 0x255   : > { %v1583_v14 = vpop.f32.mrb[12].mxu1  ;;  %v1241_v33 = vmul.f32 1.442695, %v1213_v46  ;;  %v1214_v30 = vmin.f32 %v2502_v59, 0.0  ;;  %v2510_v38 = vmul.f32 %v1760_v58, %v1561_v10  ;;  %v1564_v8 = vadd.f32 %v1563_v37, %v1562_v26  ;;  %1284 = vst [vmem:[%s2474_s28 + $0x18] sm:$0xff] %v1268_v9  ;;  %v1770_v13 = vpop.eup %1769 }
 0x256   : > { %v1584_v40 = vpop.f32.mrb[13].mxu1  ;;  %v1477_v19 = vadd.f32 -1.0, %v1768_v2  ;;  %v1772_v18 = vpop.eup %1771  ;;  %vm1198_vm11 = vcmp.gt.f32.partialorder %v2502_v59, 0.0 }
 0x257   : > { %v1585_v53 = vadd.f32 %v1584_v40, %v1583_v14  ;;  %v1586_v57 = vpop.f32.mrb[14].mxu1  ;;  %1777 = vpow2.f32 %v1241_v33  ;;  %v1243_v12 = vmul.f32 1.442695, %v1214_v30  ;;  %v1207_v25 = vmin.f32 %v2510_v38, 0.0 }
 0x258   : > { %v1587_v42 = vpop.f32.mrb[15].mxu1  ;;  %v1176_v17 = vmul.f32 %v1764_v0, %v1564_v8  ;;  %v1275_v5 = vsel %vm1195_vm1, %v2469_v35, %v1477_v19  ;;  %v1478_v15 = vadd.f32 -1.0, %v1772_v18  ;;  %vm1191_vm5 = vcmp.gt.f32.partialorder %v2510_v38, 0.0 }
 0x259   : > { %v1183_v21 = vmul.f32 %v1766_v41, %v1585_v53  ;;  %v1588_v54 = vadd.f32 %v1587_v42, %v1586_v57  ;;  %1779 = vpow2.f32 %v1243_v12  ;;  %v1229_v22 = vmul.f32 1.442695, %v1207_v25  ;;  %1291 = vst [vmem:[%s2474_s28 + $0x50] sm:$0xff] %v1275_v5 }
 0x25a   : > { %v1208_v11 = vmin.f32 %v1176_v17, 0.0  ;;  %v1276_v36 = vsel %vm1196_vm14, %v2479_v51, %v1478_v15  ;;  %vm1192_vm13 = vcmp.gt.f32.partialorder %v1176_v17, 0.0 }
 0x25b   : > { %1781 = vpow2.f32 %v1229_v22  ;;  %v1215_v52 = vmin.f32 %v1183_v21, 0.0  ;;  %v1184_v3 = vmul.f32 %v1770_v13, %v1588_v54  ;;  %1292 = vst [vmem:[%s2474_s28 + $0x58] sm:$0xff] %v1276_v36  ;;  %vm1199_vm8 = vcmp.gt.f32.partialorder %v1183_v21, 0.0 }
 0x25c   : > { %v1774_v31 = vpop.eup %1773  ;;  %v1231_v6 = vmul.f32 1.442695, %v1208_v11 }
 0x25d   : > { %v1471_v29 = vadd.f32 -1.0, %v1774_v31  ;;  %v1245_v61 = vmul.f32 1.442695, %v1215_v52  ;;  %v1216_v43 = vmin.f32 %v1184_v3, 0.0  ;;  %vm1200_vm9 = vcmp.gt.f32.partialorder %v1184_v3, 0.0 }
 0x25e   : > { %v1776_v20 = vpop.eup %1775  ;;  %1783 = vpow2.f32 %v1231_v6 }
 0x25f   : > { %v1269_v35 = vsel %vm1189_vm2, %v2487_v4, %v1471_v29  ;;  %v1472_v7 = vadd.f32 -1.0, %v1776_v20  ;;  %1785 = vpow2.f32 %v1245_v61  ;;  %v1247_v63 = vmul.f32 1.442695, %v1216_v43 }
 0x260   : > { %1285 = vst [vmem:[%s2474_s28 + $0x20] sm:$0xff] %v1269_v35 }
 0x261   : > { %v1778_v51 = vpop.eup %1777  ;;  %v1270_v27 = vsel %vm1190_vm3, %v2493_v47, %v1472_v7  ;;  %1787 = vpow2.f32 %v1247_v63 }
 0x262   : > { %1286 = vst [vmem:[%s2474_s28 + $0x28] sm:$0xff] %v1270_v27  ;;  %v1479_v23 = vadd.f32 -1.0, %v1778_v51 }
 0x263   : > { %v1780_v60 = vpop.eup %1779 }
 0x264   : > { %v1277_v4 = vsel %vm1197_vm7, %v2499_v45, %v1479_v23  ;;  %v1480_v16 = vadd.f32 -1.0, %v1780_v60 }
 0x265   : > { %v1782_v1 = vpop.eup %1781  ;;  %1293 = vst [vmem:[%s2474_s28 + $0x60] sm:$0xff] %v1277_v4 }
 0x266   : > { %v1278_v48 = vsel %vm1198_vm11, %v2502_v59, %v1480_v16  ;;  %v1473_v32 = vadd.f32 -1.0, %v1782_v1 }
 0x267   : > { %1294 = vst [vmem:[%s2474_s28 + $0x68] sm:$0xff] %v1278_v48 }
 0x268   : > { %v1784_v47 = vpop.eup %1783  ;;  %v1271_v34 = vsel %vm1191_vm5, %v2510_v38, %v1473_v32 }
 0x269   : > { %v1786_v62 = vpop.eup %1785  ;;  %1287 = vst [vmem:[%s2474_s28 + $0x30] sm:$0xff] %v1271_v34  ;;  %v1474_v49 = vadd.f32 -1.0, %v1784_v47 }
 0x26a   : > { %v1481_v39 = vadd.f32 -1.0, %v1786_v62 }
 0x26b   : > { %v1788_v45 = vpop.eup %1787  ;;  %v1272_v28 = vsel %vm1192_vm13, %v1176_v17, %v1474_v49 }
 0x26c   : > { %1288 = vst [vmem:[%s2474_s28 + $0x38] sm:$0xff] %v1272_v28  ;;  %v1279_v58 = vsel %vm1199_vm8, %v1183_v21, %v1481_v39  ;;  %v1482_v50 = vadd.f32 -1.0, %v1788_v45 }
 0x26d   : > { %1295 = vst [vmem:[%s2474_s28 + $0x70] sm:$0xff] %v1279_v58 }
 0x26e   : > { %v1280_v24 = vsel %vm1200_vm9, %v1184_v3, %v1482_v50 }
 0x26f   : > { %1296 = vst [vmem:[%s2474_s28 + $0x78] sm:$0xff] %v1280_v24 }
 0x270 PF: > { %s15_s22 = sadd.s32 1, %s1827_s22   ;;  %s2563_s18 = smov %s1819_s20 }
 0x271   : > { %p12_p8 = scmp.ge.s32.totalorder %s15_s22, 6   ;;  %s2564_s19 = smov %s1823_s21 }
 0x272   : > { %s2565_s20 = smov %s2568_s23  ;;  %s2566_s21 = smov %s2572_s24 }
 0x273   :  { %14 = sbr.rel (!%p12_p8) target bundleno = 3 (0x3), region = 79 }

</bundles_post_ra>
